<compile_context>
chip_gen: v5e
topology: v5e:2x2
jax: 0.10.0
libtpu: 0.0.40
codegen_flags: <defaults>
</compile_context>

<pallas_src>
import functools

import jax
import jax.numpy as jnp
from jax.experimental import pallas as pl
from jax.experimental.pallas import tpu as pltpu

EPS = 1e-5  # torch.nn.LayerNorm default

LAYER_PARAM_NAMES = (
    "wq", "bq", "wk", "bk", "wv", "bv", "wo", "bo",
    "ln1_g", "ln1_b", "w1", "b1", "w2", "b2", "ln2_g", "ln2_b",
)
MATMUL_WEIGHT_NAMES = ("wq", "wk", "wv", "wo", "w1", "w2")  # shipped as bf16


def _layer_norm(x, g, b):
    mu = jnp.mean(x, axis=-1, keepdims=True)
    var = jnp.mean(jnp.square(x - mu), axis=-1, keepdims=True)
    return (x - mu) * jax.lax.rsqrt(var + EPS) * g + b


# --------------------------------------------------------------------------
# Fused kernel: all N encoder layers, activation resident in out_ref.
# grid = (batch_block, layer); layer axis is sequential ("arbitrary").
# --------------------------------------------------------------------------
def fused_encoder_kernel(
    x_ref, mask_ref,
    wq_ref, bq_ref, wk_ref, bk_ref, wv_ref, bv_ref,
    wo_ref, bo_ref, g1_ref, beta1_ref,
    w1_ref, b1_ref, w2_ref, b2_ref, g2_ref, beta2_ref,
    out_ref,
    *, n_heads, d_k, d_v,
):
    layer = pl.program_id(1)
    bf16 = jnp.bfloat16

    @pl.when(layer == 0)
    def _():
        out_ref[...] = x_ref[...]          # seed the resident activation once per batch block

    Bb, S, D = out_ref.shape
    x3 = out_ref[...]                      # (Bb, S, D) f32, resident across layers
    xf = x3.reshape(Bb * S, D)             # flatten: big M dim for MXU matmuls
    x_bf = xf.astype(bf16)

    neg_mask = mask_ref[...]               # (Bb, 1, S) additive key mask (0 / -1e30), f32
    inv_sqrt_dk = jnp.float32(1.0 / (float(d_k) ** 0.5))

    # ---------------- multi-head self-attention ----------------
    # Matmul weights arrive already in bf16 (cast once on the host side).
    q = jnp.dot(x_bf, wq_ref[0], preferred_element_type=jnp.float32) + bq_ref[0]
    k = jnp.dot(x_bf, wk_ref[0], preferred_element_type=jnp.float32) + bk_ref[0]
    v = jnp.dot(x_bf, wv_ref[0], preferred_element_type=jnp.float32) + bv_ref[0]

    q3 = q.reshape(Bb, S, n_heads * d_k).astype(bf16)
    k3 = k.reshape(Bb, S, n_heads * d_k).astype(bf16)
    v3 = v.reshape(Bb, S, n_heads * d_v).astype(bf16)

    # TODO(synk): for production shapes (d_k=d_v=64) process heads in 128-lane
    # aligned pairs (or fori_loop over heads if vreg spills appear); at the
    # small test shapes the static unroll + sub-128-lane slices are fine.
    head_outs = []
    for h in range(n_heads):
        q_h = q3[:, :, h * d_k:(h + 1) * d_k]          # (Bb, S, d_k)
        k_h = k3[:, :, h * d_k:(h + 1) * d_k]
        v_h = v3[:, :, h * d_v:(h + 1) * d_v]

        s = jnp.einsum("bqd,bkd->bqk", q_h, k_h,
                       preferred_element_type=jnp.float32)          # (Bb, S, S)
        s = s * inv_sqrt_dk + neg_mask                 # scale in f32 after the dot, then mask
        s = s - jnp.max(s, axis=-1, keepdims=True)
        p = jnp.exp(s)
        p = p * pl.reciprocal(jnp.sum(p, axis=-1, keepdims=True), approx=True)

        o_h = jnp.einsum("bqk,bkd->bqd", p.astype(bf16), v_h,
                         preferred_element_type=jnp.float32)        # (Bb, S, d_v)
        head_outs.append(o_h)

    o_cat = jnp.concatenate(head_outs, axis=-1)        # (Bb, S, H*d_v)
    o_flat = o_cat.reshape(Bb * S, n_heads * d_v).astype(bf16)
    att = jnp.dot(o_flat, wo_ref[0], preferred_element_type=jnp.float32) + bo_ref[0]

    y1 = _layer_norm(xf + att, g1_ref[0], beta1_ref[0])

    # ---------------- position-wise feed-forward ----------------
    h1 = jnp.maximum(
        jnp.dot(y1.astype(bf16), w1_ref[0], preferred_element_type=jnp.float32) + b1_ref[0],
        0.0)
    h2 = jnp.dot(h1.astype(bf16), w2_ref[0], preferred_element_type=jnp.float32) + b2_ref[0]
    y2 = _layer_norm(y1 + h2, g2_ref[0], beta2_ref[0])

    out_ref[...] = y2.reshape(Bb, S, D)                # carry to next layer; HBM writeback
                                                       # happens when the batch block changes.


# --------------------------------------------------------------------------
# Wrapper
# --------------------------------------------------------------------------
def _vmem_limit_bytes():
    # ~75% of physical VMEM: ~96 MiB on v5e/v6e (128 MiB), ~48 MiB on v7x (64 MiB).
    try:
        return int(pltpu.get_tpu_info().vmem_capacity_bytes) * 3 // 4
    except Exception:
        return None  # fall back to the compiler default


def _pick_batch_block(B, S, target_rows=512):
    """Largest divisor of B such that Bb*S stays around `target_rows` MXU rows."""
    best = 1
    for bb in range(1, B + 1):
        if B % bb == 0 and bb * S <= max(target_rows, S):
            best = bb
    return best


def multi_level_encoder_forward(x, stacked_params, padding_idx, n_heads, d_k, d_v,
                                batch_block=None):
    B, S, D = x.shape
    # Mask from the RAW input, identical op to the torch module (kept in f32).
    mask_bool = jnp.sum(x, -1) == padding_idx                                   # (B, S)
    add_mask = jnp.where(mask_bool, -1e30, 0.0).astype(jnp.float32)[:, None, :]  # (B,1,S)

    weights = [stacked_params[name] for name in LAYER_PARAM_NAMES]              # each (N, ...)
    n_layers = weights[0].shape[0]

    Bb = batch_block if batch_block is not None else _pick_batch_block(B, S)
    assert B % Bb == 0, "batch block must divide batch"

    kernel = functools.partial(fused_encoder_kernel, n_heads=n_heads, d_k=d_k, d_v=d_v)

    out = pl.pallas_call(
        kernel,
        out_shape=jax.ShapeDtypeStruct((B, S, D), jnp.float32),
        grid_spec=pltpu.PrefetchScalarGridSpec(
            num_scalar_prefetch=0,
            grid=(B // Bb, n_layers),
            in_specs=[
                pl.BlockSpec((Bb, S, D), lambda b, l: (b, 0, 0)),   # activation block
                pl.BlockSpec((Bb, 1, S), lambda b, l: (b, 0, 0)),   # additive mask
            ] + [
                pl.BlockSpec((1,) + tuple(w.shape[1:]), lambda b, l: (l, 0, 0))
                for w in weights                                    # per-layer weights, pipelined over l
            ],
            out_specs=pl.BlockSpec((Bb, S, D), lambda b, l: (b, 0, 0)),
        ),
        compiler_params=pltpu.CompilerParams(
            # NOTE(v7x): the 2 TensorCores each fetch the per-layer weights; this
            # duplicated traffic is amortized by the batch block.
            dimension_semantics=("parallel", "arbitrary"),
            vmem_limit_bytes=_vmem_limit_bytes(),
        ),
    )(x, add_mask, *weights)
    return out, mask_bool[:, None, None, :]                          # (B,1,1,S) like torch


# --------------------------------------------------------------------------
# Pure-JAX reference (same math, f32) for a correctness check
# --------------------------------------------------------------------------
def ref_forward(x, layers, padding_idx, n_heads, d_k, d_v):
    mask = jnp.sum(x, -1) == padding_idx                             # (B, S)
    out = x
    for lp in layers:
        B, S, D = out.shape
        q = (out @ lp["wq"] + lp["bq"]).reshape(B, S, n_heads, d_k)
        k = (out @ lp["wk"] + lp["bk"]).reshape(B, S, n_heads, d_k)
        v = (out @ lp["wv"] + lp["bv"]).reshape(B, S, n_heads, d_v)
        s = jnp.einsum("bqhd,bkhd->bhqk", q, k) / jnp.sqrt(jnp.float32(d_k))
        s = jnp.where(mask[:, None, None, :], -1e30, s)
        p = jax.nn.softmax(s, axis=-1)
        o = jnp.einsum("bhqk,bkhd->bqhd", p, v).reshape(B, S, n_heads * d_v)
        att = o @ lp["wo"] + lp["bo"]
        y1 = _layer_norm(out + att, lp["ln1_g"], lp["ln1_b"])
        ff = jnp.maximum(y1 @ lp["w1"] + lp["b1"], 0.0) @ lp["w2"] + lp["b2"]
        out = _layer_norm(y1 + ff, lp["ln2_g"], lp["ln2_b"])
    return out, mask[:, None, None, :]


# --------------------------------------------------------------------------
# Deterministic parameter construction
# --------------------------------------------------------------------------
def make_layers(key, N, d_model, d_k, d_v, n_heads, d_ff):
    def nrm(k, shape, scale=0.05):
        return scale * jax.random.normal(k, shape, dtype=jnp.float32)

    layer_keys = jax.random.split(key, N)
    layers = []
    for li in range(N):
        lk = jax.random.split(layer_keys[li], 12)
        layers.append({
            "wq": nrm(lk[0], (d_model, n_heads * d_k)),
            "bq": nrm(lk[1], (1, n_heads * d_k)),
            "wk": nrm(lk[2], (d_model, n_heads * d_k)),
            "bk": nrm(lk[3], (1, n_heads * d_k)),
            "wv": nrm(lk[4], (d_model, n_heads * d_v)),
            "bv": nrm(lk[5], (1, n_heads * d_v)),
            "wo": nrm(lk[6], (n_heads * d_v, d_model)),
            "bo": nrm(lk[7], (1, d_model)),
            "ln1_g": jnp.ones((1, d_model), jnp.float32),
            "ln1_b": jnp.zeros((1, d_model), jnp.float32),
            "w1": nrm(lk[8], (d_model, d_ff)),
            "b1": nrm(lk[9], (1, d_ff)),
            "w2": nrm(lk[10], (d_ff, d_model)),
            "b2": nrm(lk[11], (1, d_model)),
            "ln2_g": jnp.ones((1, d_model), jnp.float32),
            "ln2_b": jnp.zeros((1, d_model), jnp.float32),
        })
    return layers


def stack_layers(layers):
    """Stack per-layer params along a leading layer axis; matmul weights -> bf16."""
    stacked = {}
    for name in LAYER_PARAM_NAMES:
        w = jnp.stack([lp[name] for lp in layers], axis=0)
        if name in MATMUL_WEIGHT_NAMES:
            w = w.astype(jnp.bfloat16)     # halve weight HBM traffic & VMEM footprint
        stacked[name] = w
    return stacked


if __name__ == "__main__":
    # Small config consistent with the module's forward (input dim == d_model).
    B, S = 2, 8
    d_model = 32
    d_k = d_v = 8
    n_heads = 4
    d_ff = 64
    N = 2
    padding_idx = 0

    key = jax.random.PRNGKey(0)
    kx, kp = jax.random.split(key)
    x = jax.random.normal(kx, (B, S, d_model), dtype=jnp.float32)
    # Make the last two sequence positions exact padding rows (sum == padding_idx).
    x = x.at[:, S - 2:, :].set(0.0)

    layers = make_layers(kp, N, d_model, d_k, d_v, n_heads, d_ff)
    stacked = stack_layers(layers)

    out, mask = multi_level_encoder_forward(x, stacked, padding_idx, n_heads, d_k, d_v)
    out = jax.block_until_ready(out)
    mask = jax.block_until_ready(mask)

    out_ref, mask_ref = ref_forward(x, layers, padding_idx, n_heads, d_k, d_v)
    assert out.shape == (B, S, d_model) and mask.shape == (B, 1, 1, S)
    assert bool(jnp.all(mask == mask_ref)), "mask mismatch"
    max_err = float(jnp.max(jnp.abs(out - out_ref)))
    assert jnp.allclose(out, out_ref, rtol=5e-2, atol=5e-2), f"max abs err {max_err}"

    print("KERNEL_OK")
</pallas_src>

<mosaic_0001>
module attributes {stable_mosaic.version = 11 : i64} {
  func.func @fused_encoder_kernel(%arg0: i32, %arg1: i32, %arg2: memref<2x8x32xf32, #tpu.memory_space<vmem>>, %arg3: memref<2x1x8xf32, #tpu.memory_space<vmem>>, %arg4: memref<1x32x32xbf16, #tpu.memory_space<vmem>>, %arg5: memref<1x1x32xf32, #tpu.memory_space<vmem>>, %arg6: memref<1x32x32xbf16, #tpu.memory_space<vmem>>, %arg7: memref<1x1x32xf32, #tpu.memory_space<vmem>>, %arg8: memref<1x32x32xbf16, #tpu.memory_space<vmem>>, %arg9: memref<1x1x32xf32, #tpu.memory_space<vmem>>, %arg10: memref<1x32x32xbf16, #tpu.memory_space<vmem>>, %arg11: memref<1x1x32xf32, #tpu.memory_space<vmem>>, %arg12: memref<1x1x32xf32, #tpu.memory_space<vmem>>, %arg13: memref<1x1x32xf32, #tpu.memory_space<vmem>>, %arg14: memref<1x32x64xbf16, #tpu.memory_space<vmem>>, %arg15: memref<1x1x64xf32, #tpu.memory_space<vmem>>, %arg16: memref<1x64x32xbf16, #tpu.memory_space<vmem>>, %arg17: memref<1x1x32xf32, #tpu.memory_space<vmem>>, %arg18: memref<1x1x32xf32, #tpu.memory_space<vmem>>, %arg19: memref<1x1x32xf32, #tpu.memory_space<vmem>>, %arg20: memref<2x8x32xf32, #tpu.memory_space<vmem>>) attributes {dimension_semantics = [#tpu.dimension_semantics<parallel>, #tpu.dimension_semantics<arbitrary>], iteration_bounds = array<i64: 1, 2>, scalar_prefetch = 0 : i64, scratch_operands = 0 : i64, tpu.core_type = #tpu.core_type<tc>, window_params = [{transform_indices = @transform_0, window_bounds = array<i64: 2, 8, 32>}, {transform_indices = @transform_1, window_bounds = array<i64: 2, 1, 8>}, {transform_indices = @transform_2, window_bounds = array<i64: 1, 32, 32>}, {transform_indices = @transform_3, window_bounds = array<i64: 1, 1, 32>}, {transform_indices = @transform_4, window_bounds = array<i64: 1, 32, 32>}, {transform_indices = @transform_5, window_bounds = array<i64: 1, 1, 32>}, {transform_indices = @transform_6, window_bounds = array<i64: 1, 32, 32>}, {transform_indices = @transform_7, window_bounds = array<i64: 1, 1, 32>}, {transform_indices = @transform_8, window_bounds = array<i64: 1, 32, 32>}, {transform_indices = @transform_9, window_bounds = array<i64: 1, 1, 32>}, {transform_indices = @transform_10, window_bounds = array<i64: 1, 1, 32>}, {transform_indices = @transform_11, window_bounds = array<i64: 1, 1, 32>}, {transform_indices = @transform_12, window_bounds = array<i64: 1, 32, 64>}, {transform_indices = @transform_13, window_bounds = array<i64: 1, 1, 64>}, {transform_indices = @transform_14, window_bounds = array<i64: 1, 64, 32>}, {transform_indices = @transform_15, window_bounds = array<i64: 1, 1, 32>}, {transform_indices = @transform_16, window_bounds = array<i64: 1, 1, 32>}, {transform_indices = @transform_17, window_bounds = array<i64: 1, 1, 32>}, {transform_indices = @transform_18, window_bounds = array<i64: 2, 8, 32>}]} {
    %c0_i32 = arith.constant 0 : i32
    %0 = arith.cmpi eq, %arg1, %c0_i32 : i32
    %1 = arith.extui %0 : i1 to i32
    %c0_i32_0 = arith.constant 0 : i32
    %2 = arith.cmpi ne, %1, %c0_i32_0 : i32
    scf.if %2 {
      %c0_93 = arith.constant 0 : index
      %c0_94 = arith.constant 0 : index
      %c0_95 = arith.constant 0 : index
      %198 = vector.load %arg2[%c0_93, %c0_94, %c0_95] : memref<2x8x32xf32, #tpu.memory_space<vmem>>, vector<2x8x32xf32>
      %c0_96 = arith.constant 0 : index
      %c0_97 = arith.constant 0 : index
      %c0_98 = arith.constant 0 : index
      %199 = vector.load %arg20[%c0_96, %c0_97, %c0_98] : memref<2x8x32xf32, #tpu.memory_space<vmem>>, vector<2x8x32xf32>
      tpu.vector_store %arg20[%c0_96, %c0_97, %c0_98], %198 {strides = array<i32>} : memref<2x8x32xf32, #tpu.memory_space<vmem>>, vector<2x8x32xf32>,
    } else {
    }
    %c0 = arith.constant 0 : index
    %c0_1 = arith.constant 0 : index
    %c0_2 = arith.constant 0 : index
    %3 = vector.load %arg20[%c0, %c0_1, %c0_2] : memref<2x8x32xf32, #tpu.memory_space<vmem>>, vector<2x8x32xf32>
    %4 = vector.shape_cast %3 : vector<2x8x32xf32> to vector<16x32xf32>
    %5 = arith.truncf %4 : vector<16x32xf32> to vector<16x32xbf16>
    %c0_3 = arith.constant 0 : index
    %c0_4 = arith.constant 0 : index
    %c0_5 = arith.constant 0 : index
    %6 = vector.load %arg3[%c0_3, %c0_4, %c0_5] : memref<2x1x8xf32, #tpu.memory_space<vmem>>, vector<2x1x8xf32>
    %c0_6 = arith.constant 0 : index
    %c0_7 = arith.constant 0 : index
    %c0_8 = arith.constant 0 : index
    %7 = vector.load %arg4[%c0_6, %c0_7, %c0_8] : memref<1x32x32xbf16, #tpu.memory_space<vmem>>, vector<1x32x32xbf16>
    %8 = vector.shape_cast %7 : vector<1x32x32xbf16> to vector<32x32xbf16>
    %cst = arith.constant dense<0.000000e+00> : vector<16x32xf32>
    %9 = tpu.matmul %5, %8, %cst {dimension_numbers = #tpu.dot_dimension_numbers<[1], [0], [0], [1], [0, 0, 1, 1], [], []>} : vector<16x32xbf16>, vector<32x32xbf16>, vector<16x32xf32> -> vector<16x32xf32>
    %c0_9 = arith.constant 0 : index
    %c0_10 = arith.constant 0 : index
    %c0_11 = arith.constant 0 : index
    %10 = vector.load %arg5[%c0_9, %c0_10, %c0_11] : memref<1x1x32xf32, #tpu.memory_space<vmem>>, vector<1x1x32xf32>
    %11 = vector.shape_cast %10 : vector<1x1x32xf32> to vector<1x32xf32>
    %12 = vector.broadcast %11 : vector<1x32xf32> to vector<16x32xf32>
    %13 = arith.addf %9, %12 : vector<16x32xf32>
    %c0_12 = arith.constant 0 : index
    %c0_13 = arith.constant 0 : index
    %c0_14 = arith.constant 0 : index
    %14 = vector.load %arg6[%c0_12, %c0_13, %c0_14] : memref<1x32x32xbf16, #tpu.memory_space<vmem>>, vector<1x32x32xbf16>
    %15 = vector.shape_cast %14 : vector<1x32x32xbf16> to vector<32x32xbf16>
    %cst_15 = arith.constant dense<0.000000e+00> : vector<16x32xf32>
    %16 = tpu.matmul %5, %15, %cst_15 {dimension_numbers = #tpu.dot_dimension_numbers<[1], [0], [0], [1], [0, 0, 1, 1], [], []>} : vector<16x32xbf16>, vector<32x32xbf16>, vector<16x32xf32> -> vector<16x32xf32>
    %c0_16 = arith.constant 0 : index
    %c0_17 = arith.constant 0 : index
    %c0_18 = arith.constant 0 : index
    %17 = vector.load %arg7[%c0_16, %c0_17, %c0_18] : memref<1x1x32xf32, #tpu.memory_space<vmem>>, vector<1x1x32xf32>
    %18 = vector.shape_cast %17 : vector<1x1x32xf32> to vector<1x32xf32>
    %19 = vector.broadcast %18 : vector<1x32xf32> to vector<16x32xf32>
    %20 = arith.addf %16, %19 : vector<16x32xf32>
    %c0_19 = arith.constant 0 : index
    %c0_20 = arith.constant 0 : index
    %c0_21 = arith.constant 0 : index
    %21 = vector.load %arg8[%c0_19, %c0_20, %c0_21] : memref<1x32x32xbf16, #tpu.memory_space<vmem>>, vector<1x32x32xbf16>
    %22 = vector.shape_cast %21 : vector<1x32x32xbf16> to vector<32x32xbf16>
    %cst_22 = arith.constant dense<0.000000e+00> : vector<16x32xf32>
    %23 = tpu.matmul %5, %22, %cst_22 {dimension_numbers = #tpu.dot_dimension_numbers<[1], [0], [0], [1], [0, 0, 1, 1], [], []>} : vector<16x32xbf16>, vector<32x32xbf16>, vector<16x32xf32> -> vector<16x32xf32>
    %c0_23 = arith.constant 0 : index
    %c0_24 = arith.constant 0 : index
    %c0_25 = arith.constant 0 : index
    %24 = vector.load %arg9[%c0_23, %c0_24, %c0_25] : memref<1x1x32xf32, #tpu.memory_space<vmem>>, vector<1x1x32xf32>
    %25 = vector.shape_cast %24 : vector<1x1x32xf32> to vector<1x32xf32>
    %26 = vector.broadcast %25 : vector<1x32xf32> to vector<16x32xf32>
    %27 = arith.addf %23, %26 : vector<16x32xf32>
    %28 = vector.shape_cast %13 : vector<16x32xf32> to vector<2x8x32xf32>
    %29 = arith.truncf %28 : vector<2x8x32xf32> to vector<2x8x32xbf16>
    %30 = vector.shape_cast %20 : vector<16x32xf32> to vector<2x8x32xf32>
    %31 = arith.truncf %30 : vector<2x8x32xf32> to vector<2x8x32xbf16>
    %32 = vector.shape_cast %27 : vector<16x32xf32> to vector<2x8x32xf32>
    %33 = arith.truncf %32 : vector<2x8x32xf32> to vector<2x8x32xbf16>
    %34 = vector.extract_strided_slice %29 {offsets = [0, 0, 0], sizes = [2, 8, 8], strides = [1, 1, 1]} : vector<2x8x32xbf16> to vector<2x8x8xbf16>
    %35 = vector.extract_strided_slice %31 {offsets = [0, 0, 0], sizes = [2, 8, 8], strides = [1, 1, 1]} : vector<2x8x32xbf16> to vector<2x8x8xbf16>
    %36 = vector.extract_strided_slice %33 {offsets = [0, 0, 0], sizes = [2, 8, 8], strides = [1, 1, 1]} : vector<2x8x32xbf16> to vector<2x8x8xbf16>
    "tpu.trace_start"() <{level = 10 : i32, message = "bqd,bkd->bqk"}> : () -> ()
    %cst_26 = arith.constant dense<0.000000e+00> : vector<2x8x8xf32>
    %37 = tpu.matmul %34, %35, %cst_26 {dimension_numbers = #tpu.dot_dimension_numbers<[2], [2], [1], [1], [0, 0, 0, 1, 1, 1], [0], [0]>} : vector<2x8x8xbf16>, vector<2x8x8xbf16>, vector<2x8x8xf32> -> vector<2x8x8xf32>
    "tpu.trace_stop"() : () -> ()
    %cst_27 = arith.constant 0.353553385 : f32
    %38 = vector.broadcast %cst_27 : f32 to vector<2x8x8xf32>
    %39 = arith.mulf %37, %38 : vector<2x8x8xf32>
    %40 = vector.broadcast %6 : vector<2x1x8xf32> to vector<2x8x8xf32>
    %41 = arith.addf %39, %40 : vector<2x8x8xf32>
    %cst_28 = arith.constant dense<0xFF800000> : vector<2x8xf32>
    %42 = vector.multi_reduction <maximumf>, %41, %cst_28 [2] : vector<2x8x8xf32> to vector<2x8xf32>
    %43 = vector.shape_cast %42 : vector<2x8xf32> to vector<2x8x1xf32>
    %44 = vector.broadcast %43 : vector<2x8x1xf32> to vector<2x8x8xf32>
    %45 = arith.subf %41, %44 : vector<2x8x8xf32>
    %46 = math.exp %45 : vector<2x8x8xf32>
    %cst_29 = arith.constant dense<0.000000e+00> : vector<2x8xf32>
    %47 = vector.multi_reduction <add>, %46, %cst_29 [2] : vector<2x8x8xf32> to vector<2x8xf32>
    %48 = vector.shape_cast %47 : vector<2x8xf32> to vector<2x8x1xf32>
    %49 = tpu.reciprocal %48 {approx = true} : vector<2x8x1xf32> -> vector<2x8x1xf32>
    %50 = vector.broadcast %49 : vector<2x8x1xf32> to vector<2x8x8xf32>
    %51 = arith.mulf %46, %50 : vector<2x8x8xf32>
    %52 = arith.truncf %51 : vector<2x8x8xf32> to vector<2x8x8xbf16>
    "tpu.trace_start"() <{level = 10 : i32, message = "bqk,bkd->bqd"}> : () -> ()
    %cst_30 = arith.constant dense<0.000000e+00> : vector<2x8x8xf32>
    %53 = tpu.matmul %52, %36, %cst_30 {dimension_numbers = #tpu.dot_dimension_numbers<[2], [1], [1], [2], [0, 0, 0, 1, 1, 2], [0], [0]>} : vector<2x8x8xbf16>, vector<2x8x8xbf16>, vector<2x8x8xf32> -> vector<2x8x8xf32>
    "tpu.trace_stop"() : () -> ()
    %54 = vector.extract_strided_slice %29 {offsets = [0, 0, 8], sizes = [2, 8, 8], strides = [1, 1, 1]} : vector<2x8x32xbf16> to vector<2x8x8xbf16>
    %55 = vector.extract_strided_slice %31 {offsets = [0, 0, 8], sizes = [2, 8, 8], strides = [1, 1, 1]} : vector<2x8x32xbf16> to vector<2x8x8xbf16>
    %56 = vector.extract_strided_slice %33 {offsets = [0, 0, 8], sizes = [2, 8, 8], strides = [1, 1, 1]} : vector<2x8x32xbf16> to vector<2x8x8xbf16>
    "tpu.trace_start"() <{level = 10 : i32, message = "bqd,bkd->bqk"}> : () -> ()
    %cst_31 = arith.constant dense<0.000000e+00> : vector<2x8x8xf32>
    %57 = tpu.matmul %54, %55, %cst_31 {dimension_numbers = #tpu.dot_dimension_numbers<[2], [2], [1], [1], [0, 0, 0, 1, 1, 1], [0], [0]>} : vector<2x8x8xbf16>, vector<2x8x8xbf16>, vector<2x8x8xf32> -> vector<2x8x8xf32>
    "tpu.trace_stop"() : () -> ()
    %cst_32 = arith.constant 0.353553385 : f32
    %58 = vector.broadcast %cst_32 : f32 to vector<2x8x8xf32>
    %59 = arith.mulf %57, %58 : vector<2x8x8xf32>
    %60 = vector.broadcast %6 : vector<2x1x8xf32> to vector<2x8x8xf32>
    %61 = arith.addf %59, %60 : vector<2x8x8xf32>
    %cst_33 = arith.constant dense<0xFF800000> : vector<2x8xf32>
    %62 = vector.multi_reduction <maximumf>, %61, %cst_33 [2] : vector<2x8x8xf32> to vector<2x8xf32>
    %63 = vector.shape_cast %62 : vector<2x8xf32> to vector<2x8x1xf32>
    %64 = vector.broadcast %63 : vector<2x8x1xf32> to vector<2x8x8xf32>
    %65 = arith.subf %61, %64 : vector<2x8x8xf32>
    %66 = math.exp %65 : vector<2x8x8xf32>
    %cst_34 = arith.constant dense<0.000000e+00> : vector<2x8xf32>
    %67 = vector.multi_reduction <add>, %66, %cst_34 [2] : vector<2x8x8xf32> to vector<2x8xf32>
    %68 = vector.shape_cast %67 : vector<2x8xf32> to vector<2x8x1xf32>
    %69 = tpu.reciprocal %68 {approx = true} : vector<2x8x1xf32> -> vector<2x8x1xf32>
    %70 = vector.broadcast %69 : vector<2x8x1xf32> to vector<2x8x8xf32>
    %71 = arith.mulf %66, %70 : vector<2x8x8xf32>
    %72 = arith.truncf %71 : vector<2x8x8xf32> to vector<2x8x8xbf16>
    "tpu.trace_start"() <{level = 10 : i32, message = "bqk,bkd->bqd"}> : () -> ()
    %cst_35 = arith.constant dense<0.000000e+00> : vector<2x8x8xf32>
    %73 = tpu.matmul %72, %56, %cst_35 {dimension_numbers = #tpu.dot_dimension_numbers<[2], [1], [1], [2], [0, 0, 0, 1, 1, 2], [0], [0]>} : vector<2x8x8xbf16>, vector<2x8x8xbf16>, vector<2x8x8xf32> -> vector<2x8x8xf32>
    "tpu.trace_stop"() : () -> ()
    %74 = vector.extract_strided_slice %29 {offsets = [0, 0, 16], sizes = [2, 8, 8], strides = [1, 1, 1]} : vector<2x8x32xbf16> to vector<2x8x8xbf16>
    %75 = vector.extract_strided_slice %31 {offsets = [0, 0, 16], sizes = [2, 8, 8], strides = [1, 1, 1]} : vector<2x8x32xbf16> to vector<2x8x8xbf16>
    %76 = vector.extract_strided_slice %33 {offsets = [0, 0, 16], sizes = [2, 8, 8], strides = [1, 1, 1]} : vector<2x8x32xbf16> to vector<2x8x8xbf16>
    "tpu.trace_start"() <{level = 10 : i32, message = "bqd,bkd->bqk"}> : () -> ()
    %cst_36 = arith.constant dense<0.000000e+00> : vector<2x8x8xf32>
    %77 = tpu.matmul %74, %75, %cst_36 {dimension_numbers = #tpu.dot_dimension_numbers<[2], [2], [1], [1], [0, 0, 0, 1, 1, 1], [0], [0]>} : vector<2x8x8xbf16>, vector<2x8x8xbf16>, vector<2x8x8xf32> -> vector<2x8x8xf32>
    "tpu.trace_stop"() : () -> ()
    %cst_37 = arith.constant 0.353553385 : f32
    %78 = vector.broadcast %cst_37 : f32 to vector<2x8x8xf32>
    %79 = arith.mulf %77, %78 : vector<2x8x8xf32>
    %80 = vector.broadcast %6 : vector<2x1x8xf32> to vector<2x8x8xf32>
    %81 = arith.addf %79, %80 : vector<2x8x8xf32>
    %cst_38 = arith.constant dense<0xFF800000> : vector<2x8xf32>
    %82 = vector.multi_reduction <maximumf>, %81, %cst_38 [2] : vector<2x8x8xf32> to vector<2x8xf32>
    %83 = vector.shape_cast %82 : vector<2x8xf32> to vector<2x8x1xf32>
    %84 = vector.broadcast %83 : vector<2x8x1xf32> to vector<2x8x8xf32>
    %85 = arith.subf %81, %84 : vector<2x8x8xf32>
    %86 = math.exp %85 : vector<2x8x8xf32>
    %cst_39 = arith.constant dense<0.000000e+00> : vector<2x8xf32>
    %87 = vector.multi_reduction <add>, %86, %cst_39 [2] : vector<2x8x8xf32> to vector<2x8xf32>
    %88 = vector.shape_cast %87 : vector<2x8xf32> to vector<2x8x1xf32>
    %89 = tpu.reciprocal %88 {approx = true} : vector<2x8x1xf32> -> vector<2x8x1xf32>
    %90 = vector.broadcast %89 : vector<2x8x1xf32> to vector<2x8x8xf32>
    %91 = arith.mulf %86, %90 : vector<2x8x8xf32>
    %92 = arith.truncf %91 : vector<2x8x8xf32> to vector<2x8x8xbf16>
    "tpu.trace_start"() <{level = 10 : i32, message = "bqk,bkd->bqd"}> : () -> ()
    %cst_40 = arith.constant dense<0.000000e+00> : vector<2x8x8xf32>
    %93 = tpu.matmul %92, %76, %cst_40 {dimension_numbers = #tpu.dot_dimension_numbers<[2], [1], [1], [2], [0, 0, 0, 1, 1, 2], [0], [0]>} : vector<2x8x8xbf16>, vector<2x8x8xbf16>, vector<2x8x8xf32> -> vector<2x8x8xf32>
    "tpu.trace_stop"() : () -> ()
    %94 = vector.extract_strided_slice %29 {offsets = [0, 0, 24], sizes = [2, 8, 8], strides = [1, 1, 1]} : vector<2x8x32xbf16> to vector<2x8x8xbf16>
    %95 = vector.extract_strided_slice %31 {offsets = [0, 0, 24], sizes = [2, 8, 8], strides = [1, 1, 1]} : vector<2x8x32xbf16> to vector<2x8x8xbf16>
    %96 = vector.extract_strided_slice %33 {offsets = [0, 0, 24], sizes = [2, 8, 8], strides = [1, 1, 1]} : vector<2x8x32xbf16> to vector<2x8x8xbf16>
    "tpu.trace_start"() <{level = 10 : i32, message = "bqd,bkd->bqk"}> : () -> ()
    %cst_41 = arith.constant dense<0.000000e+00> : vector<2x8x8xf32>
    %97 = tpu.matmul %94, %95, %cst_41 {dimension_numbers = #tpu.dot_dimension_numbers<[2], [2], [1], [1], [0, 0, 0, 1, 1, 1], [0], [0]>} : vector<2x8x8xbf16>, vector<2x8x8xbf16>, vector<2x8x8xf32> -> vector<2x8x8xf32>
    "tpu.trace_stop"() : () -> ()
    %cst_42 = arith.constant 0.353553385 : f32
    %98 = vector.broadcast %cst_42 : f32 to vector<2x8x8xf32>
    %99 = arith.mulf %97, %98 : vector<2x8x8xf32>
    %100 = vector.broadcast %6 : vector<2x1x8xf32> to vector<2x8x8xf32>
    %101 = arith.addf %99, %100 : vector<2x8x8xf32>
    %cst_43 = arith.constant dense<0xFF800000> : vector<2x8xf32>
    %102 = vector.multi_reduction <maximumf>, %101, %cst_43 [2] : vector<2x8x8xf32> to vector<2x8xf32>
    %103 = vector.shape_cast %102 : vector<2x8xf32> to vector<2x8x1xf32>
    %104 = vector.broadcast %103 : vector<2x8x1xf32> to vector<2x8x8xf32>
    %105 = arith.subf %101, %104 : vector<2x8x8xf32>
    %106 = math.exp %105 : vector<2x8x8xf32>
    %cst_44 = arith.constant dense<0.000000e+00> : vector<2x8xf32>
    %107 = vector.multi_reduction <add>, %106, %cst_44 [2] : vector<2x8x8xf32> to vector<2x8xf32>
    %108 = vector.shape_cast %107 : vector<2x8xf32> to vector<2x8x1xf32>
    %109 = tpu.reciprocal %108 {approx = true} : vector<2x8x1xf32> -> vector<2x8x1xf32>
    %110 = vector.broadcast %109 : vector<2x8x1xf32> to vector<2x8x8xf32>
    %111 = arith.mulf %106, %110 : vector<2x8x8xf32>
    %112 = arith.truncf %111 : vector<2x8x8xf32> to vector<2x8x8xbf16>
    "tpu.trace_start"() <{level = 10 : i32, message = "bqk,bkd->bqd"}> : () -> ()
    %cst_45 = arith.constant dense<0.000000e+00> : vector<2x8x8xf32>
    %113 = tpu.matmul %112, %96, %cst_45 {dimension_numbers = #tpu.dot_dimension_numbers<[2], [1], [1], [2], [0, 0, 0, 1, 1, 2], [0], [0]>} : vector<2x8x8xbf16>, vector<2x8x8xbf16>, vector<2x8x8xf32> -> vector<2x8x8xf32>
    "tpu.trace_stop"() : () -> ()
    %114 = tpu.concatenate %53, %73, %93, %113 in 2 : vector<2x8x8xf32>, vector<2x8x8xf32>, vector<2x8x8xf32>, vector<2x8x8xf32> -> vector<2x8x32xf32>
    %115 = vector.shape_cast %114 : vector<2x8x32xf32> to vector<16x32xf32>
    %116 = arith.truncf %115 : vector<16x32xf32> to vector<16x32xbf16>
    %c0_46 = arith.constant 0 : index
    %c0_47 = arith.constant 0 : index
    %c0_48 = arith.constant 0 : index
    %117 = vector.load %arg10[%c0_46, %c0_47, %c0_48] : memref<1x32x32xbf16, #tpu.memory_space<vmem>>, vector<1x32x32xbf16>
    %118 = vector.shape_cast %117 : vector<1x32x32xbf16> to vector<32x32xbf16>
    %cst_49 = arith.constant dense<0.000000e+00> : vector<16x32xf32>
    %119 = tpu.matmul %116, %118, %cst_49 {dimension_numbers = #tpu.dot_dimension_numbers<[1], [0], [0], [1], [0, 0, 1, 1], [], []>} : vector<16x32xbf16>, vector<32x32xbf16>, vector<16x32xf32> -> vector<16x32xf32>
    %c0_50 = arith.constant 0 : index
    %c0_51 = arith.constant 0 : index
    %c0_52 = arith.constant 0 : index
    %120 = vector.load %arg11[%c0_50, %c0_51, %c0_52] : memref<1x1x32xf32, #tpu.memory_space<vmem>>, vector<1x1x32xf32>
    %121 = vector.shape_cast %120 : vector<1x1x32xf32> to vector<1x32xf32>
    %122 = vector.broadcast %121 : vector<1x32xf32> to vector<16x32xf32>
    %123 = arith.addf %119, %122 : vector<16x32xf32>
    %124 = arith.addf %4, %123 : vector<16x32xf32>
    %c0_53 = arith.constant 0 : index
    %c0_54 = arith.constant 0 : index
    %c0_55 = arith.constant 0 : index
    %125 = vector.load %arg12[%c0_53, %c0_54, %c0_55] : memref<1x1x32xf32, #tpu.memory_space<vmem>>, vector<1x1x32xf32>
    %126 = vector.shape_cast %125 : vector<1x1x32xf32> to vector<1x32xf32>
    %c0_56 = arith.constant 0 : index
    %c0_57 = arith.constant 0 : index
    %c0_58 = arith.constant 0 : index
    %127 = vector.load %arg13[%c0_56, %c0_57, %c0_58] : memref<1x1x32xf32, #tpu.memory_space<vmem>>, vector<1x1x32xf32>
    %128 = vector.shape_cast %127 : vector<1x1x32xf32> to vector<1x32xf32>
    %cst_59 = arith.constant dense<0.000000e+00> : vector<16xf32>
    %129 = vector.multi_reduction <add>, %124, %cst_59 [1] : vector<16x32xf32> to vector<16xf32>
    %130 = vector.shape_cast %129 : vector<16xf32> to vector<16x1xf32>
    %cst_60 = arith.constant 3.200000e+01 : f32
    %131 = vector.broadcast %cst_60 : f32 to vector<16x1xf32>
    %132 = arith.divf %130, %131 : vector<16x1xf32>
    %133 = vector.broadcast %132 : vector<16x1xf32> to vector<16x32xf32>
    %134 = arith.subf %124, %133 : vector<16x32xf32>
    %135 = arith.mulf %134, %134 : vector<16x32xf32>
    %cst_61 = arith.constant dense<0.000000e+00> : vector<16xf32>
    %136 = vector.multi_reduction <add>, %135, %cst_61 [1] : vector<16x32xf32> to vector<16xf32>
    %137 = vector.shape_cast %136 : vector<16xf32> to vector<16x1xf32>
    %cst_62 = arith.constant 3.200000e+01 : f32
    %138 = vector.broadcast %cst_62 : f32 to vector<16x1xf32>
    %139 = arith.divf %137, %138 : vector<16x1xf32>
    %140 = vector.broadcast %132 : vector<16x1xf32> to vector<16x32xf32>
    %141 = arith.subf %124, %140 : vector<16x32xf32>
    %cst_63 = arith.constant 9.99999974E-6 : f32
    %142 = vector.broadcast %cst_63 : f32 to vector<16x1xf32>
    %143 = arith.addf %139, %142 : vector<16x1xf32>
    %144 = math.rsqrt %143 : vector<16x1xf32>
    %145 = vector.broadcast %144 : vector<16x1xf32> to vector<16x32xf32>
    %146 = arith.mulf %141, %145 : vector<16x32xf32>
    %147 = vector.broadcast %126 : vector<1x32xf32> to vector<16x32xf32>
    %148 = arith.mulf %146, %147 : vector<16x32xf32>
    %149 = vector.broadcast %128 : vector<1x32xf32> to vector<16x32xf32>
    %150 = arith.addf %148, %149 : vector<16x32xf32>
    %151 = arith.truncf %150 : vector<16x32xf32> to vector<16x32xbf16>
    %c0_64 = arith.constant 0 : index
    %c0_65 = arith.constant 0 : index
    %c0_66 = arith.constant 0 : index
    %152 = vector.load %arg14[%c0_64, %c0_65, %c0_66] : memref<1x32x64xbf16, #tpu.memory_space<vmem>>, vector<1x32x64xbf16>
    %153 = vector.shape_cast %152 : vector<1x32x64xbf16> to vector<32x64xbf16>
    %cst_67 = arith.constant dense<0.000000e+00> : vector<16x64xf32>
    %154 = tpu.matmul %151, %153, %cst_67 {dimension_numbers = #tpu.dot_dimension_numbers<[1], [0], [0], [1], [0, 0, 1, 1], [], []>} : vector<16x32xbf16>, vector<32x64xbf16>, vector<16x64xf32> -> vector<16x64xf32>
    %c0_68 = arith.constant 0 : index
    %c0_69 = arith.constant 0 : index
    %c0_70 = arith.constant 0 : index
    %155 = vector.load %arg15[%c0_68, %c0_69, %c0_70] : memref<1x1x64xf32, #tpu.memory_space<vmem>>, vector<1x1x64xf32>
    %156 = vector.shape_cast %155 : vector<1x1x64xf32> to vector<1x64xf32>
    %157 = vector.broadcast %156 : vector<1x64xf32> to vector<16x64xf32>
    %158 = arith.addf %154, %157 : vector<16x64xf32>
    %cst_71 = arith.constant 0.000000e+00 : f32
    %159 = vector.broadcast %cst_71 : f32 to vector<16x64xf32>
    %160 = arith.maximumf %158, %159 : vector<16x64xf32>
    %161 = arith.truncf %160 : vector<16x64xf32> to vector<16x64xbf16>
    %c0_72 = arith.constant 0 : index
    %c0_73 = arith.constant 0 : index
    %c0_74 = arith.constant 0 : index
    %162 = vector.load %arg16[%c0_72, %c0_73, %c0_74] : memref<1x64x32xbf16, #tpu.memory_space<vmem>>, vector<1x64x32xbf16>
    %163 = vector.shape_cast %162 : vector<1x64x32xbf16> to vector<64x32xbf16>
    %cst_75 = arith.constant dense<0.000000e+00> : vector<16x32xf32>
    %164 = tpu.matmul %161, %163, %cst_75 {dimension_numbers = #tpu.dot_dimension_numbers<[1], [0], [0], [1], [0, 0, 1, 1], [], []>} : vector<16x64xbf16>, vector<64x32xbf16>, vector<16x32xf32> -> vector<16x32xf32>
    %c0_76 = arith.constant 0 : index
    %c0_77 = arith.constant 0 : index
    %c0_78 = arith.constant 0 : index
    %165 = vector.load %arg17[%c0_76, %c0_77, %c0_78] : memref<1x1x32xf32, #tpu.memory_space<vmem>>, vector<1x1x32xf32>
    %166 = vector.shape_cast %165 : vector<1x1x32xf32> to vector<1x32xf32>
    %167 = vector.broadcast %166 : vector<1x32xf32> to vector<16x32xf32>
    %168 = arith.addf %164, %167 : vector<16x32xf32>
    %169 = arith.addf %150, %168 : vector<16x32xf32>
    %c0_79 = arith.constant 0 : index
    %c0_80 = arith.constant 0 : index
    %c0_81 = arith.constant 0 : index
    %170 = vector.load %arg18[%c0_79, %c0_80, %c0_81] : memref<1x1x32xf32, #tpu.memory_space<vmem>>, vector<1x1x32xf32>
    %171 = vector.shape_cast %170 : vector<1x1x32xf32> to vector<1x32xf32>
    %c0_82 = arith.constant 0 : index
    %c0_83 = arith.constant 0 : index
    %c0_84 = arith.constant 0 : index
    %172 = vector.load %arg19[%c0_82, %c0_83, %c0_84] : memref<1x1x32xf32, #tpu.memory_space<vmem>>, vector<1x1x32xf32>
    %173 = vector.shape_cast %172 : vector<1x1x32xf32> to vector<1x32xf32>
    %cst_85 = arith.constant dense<0.000000e+00> : vector<16xf32>
    %174 = vector.multi_reduction <add>, %169, %cst_85 [1] : vector<16x32xf32> to vector<16xf32>
    %175 = vector.shape_cast %174 : vector<16xf32> to vector<16x1xf32>
    %cst_86 = arith.constant 3.200000e+01 : f32
    %176 = vector.broadcast %cst_86 : f32 to vector<16x1xf32>
    %177 = arith.divf %175, %176 : vector<16x1xf32>
    %178 = vector.broadcast %177 : vector<16x1xf32> to vector<16x32xf32>
    %179 = arith.subf %169, %178 : vector<16x32xf32>
    %180 = arith.mulf %179, %179 : vector<16x32xf32>
    %cst_87 = arith.constant dense<0.000000e+00> : vector<16xf32>
    %181 = vector.multi_reduction <add>, %180, %cst_87 [1] : vector<16x32xf32> to vector<16xf32>
    %182 = vector.shape_cast %181 : vector<16xf32> to vector<16x1xf32>
    %cst_88 = arith.constant 3.200000e+01 : f32
    %183 = vector.broadcast %cst_88 : f32 to vector<16x1xf32>
    %184 = arith.divf %182, %183 : vector<16x1xf32>
    %185 = vector.broadcast %177 : vector<16x1xf32> to vector<16x32xf32>
    %186 = arith.subf %169, %185 : vector<16x32xf32>
    %cst_89 = arith.constant 9.99999974E-6 : f32
    %187 = vector.broadcast %cst_89 : f32 to vector<16x1xf32>
    %188 = arith.addf %184, %187 : vector<16x1xf32>
    %189 = math.rsqrt %188 : vector<16x1xf32>
    %190 = vector.broadcast %189 : vector<16x1xf32> to vector<16x32xf32>
    %191 = arith.mulf %186, %190 : vector<16x32xf32>
    %192 = vector.broadcast %171 : vector<1x32xf32> to vector<16x32xf32>
    %193 = arith.mulf %191, %192 : vector<16x32xf32>
    %194 = vector.broadcast %173 : vector<1x32xf32> to vector<16x32xf32>
    %195 = arith.addf %193, %194 : vector<16x32xf32>
    %196 = vector.shape_cast %195 : vector<16x32xf32> to vector<2x8x32xf32>
    %c0_90 = arith.constant 0 : index
    %c0_91 = arith.constant 0 : index
    %c0_92 = arith.constant 0 : index
    %197 = vector.load %arg20[%c0_90, %c0_91, %c0_92] : memref<2x8x32xf32, #tpu.memory_space<vmem>>, vector<2x8x32xf32>
    tpu.vector_store %arg20[%c0_90, %c0_91, %c0_92], %196 {strides = array<i32>} : memref<2x8x32xf32, #tpu.memory_space<vmem>>, vector<2x8x32xf32>,
    return
  }
  func.func @transform_0(%arg0: i32, %arg1: i32) -> (i32, i32, i32) {
    %c0_i32 = arith.constant 0 : i32
    %c0_i32_0 = arith.constant 0 : i32
    %c0_i32_1 = arith.constant 0 : i32
    return %arg0, %c0_i32, %c0_i32_0 : i32, i32, i32
  }
  func.func @transform_1(%arg0: i32, %arg1: i32) -> (i32, i32, i32) {
    %c0_i32 = arith.constant 0 : i32
    %c0_i32_0 = arith.constant 0 : i32
    %c0_i32_1 = arith.constant 0 : i32
    return %arg0, %c0_i32, %c0_i32_0 : i32, i32, i32
  }
  func.func @transform_2(%arg0: i32, %arg1: i32) -> (i32, i32, i32) {
    %c0_i32 = arith.constant 0 : i32
    %c0_i32_0 = arith.constant 0 : i32
    %c0_i32_1 = arith.constant 0 : i32
    return %arg1, %c0_i32, %c0_i32_0 : i32, i32, i32
  }
  func.func @transform_3(%arg0: i32, %arg1: i32) -> (i32, i32, i32) {
    %c0_i32 = arith.constant 0 : i32
    %c0_i32_0 = arith.constant 0 : i32
    %c0_i32_1 = arith.constant 0 : i32
    return %arg1, %c0_i32, %c0_i32_0 : i32, i32, i32
  }
  func.func @transform_4(%arg0: i32, %arg1: i32) -> (i32, i32, i32) {
    %c0_i32 = arith.constant 0 : i32
    %c0_i32_0 = arith.constant 0 : i32
    %c0_i32_1 = arith.constant 0 : i32
    return %arg1, %c0_i32, %c0_i32_0 : i32, i32, i32
  }
  func.func @transform_5(%arg0: i32, %arg1: i32) -> (i32, i32, i32) {
    %c0_i32 = arith.constant 0 : i32
    %c0_i32_0 = arith.constant 0 : i32
    %c0_i32_1 = arith.constant 0 : i32
    return %arg1, %c0_i32, %c0_i32_0 : i32, i32, i32
  }
  func.func @transform_6(%arg0: i32, %arg1: i32) -> (i32, i32, i32) {
    %c0_i32 = arith.constant 0 : i32
    %c0_i32_0 = arith.constant 0 : i32
    %c0_i32_1 = arith.constant 0 : i32
    return %arg1, %c0_i32, %c0_i32_0 : i32, i32, i32
  }
  func.func @transform_7(%arg0: i32, %arg1: i32) -> (i32, i32, i32) {
    %c0_i32 = arith.constant 0 : i32
    %c0_i32_0 = arith.constant 0 : i32
    %c0_i32_1 = arith.constant 0 : i32
    return %arg1, %c0_i32, %c0_i32_0 : i32, i32, i32
  }
  func.func @transform_8(%arg0: i32, %arg1: i32) -> (i32, i32, i32) {
    %c0_i32 = arith.constant 0 : i32
    %c0_i32_0 = arith.constant 0 : i32
    %c0_i32_1 = arith.constant 0 : i32
    return %arg1, %c0_i32, %c0_i32_0 : i32, i32, i32
  }
  func.func @transform_9(%arg0: i32, %arg1: i32) -> (i32, i32, i32) {
    %c0_i32 = arith.constant 0 : i32
    %c0_i32_0 = arith.constant 0 : i32
    %c0_i32_1 = arith.constant 0 : i32
    return %arg1, %c0_i32, %c0_i32_0 : i32, i32, i32
  }
  func.func @transform_10(%arg0: i32, %arg1: i32) -> (i32, i32, i32) {
    %c0_i32 = arith.constant 0 : i32
    %c0_i32_0 = arith.constant 0 : i32
    %c0_i32_1 = arith.constant 0 : i32
    return %arg1, %c0_i32, %c0_i32_0 : i32, i32, i32
  }
  func.func @transform_11(%arg0: i32, %arg1: i32) -> (i32, i32, i32) {
    %c0_i32 = arith.constant 0 : i32
    %c0_i32_0 = arith.constant 0 : i32
    %c0_i32_1 = arith.constant 0 : i32
    return %arg1, %c0_i32, %c0_i32_0 : i32, i32, i32
  }
  func.func @transform_12(%arg0: i32, %arg1: i32) -> (i32, i32, i32) {
    %c0_i32 = arith.constant 0 : i32
    %c0_i32_0 = arith.constant 0 : i32
    %c0_i32_1 = arith.constant 0 : i32
    return %arg1, %c0_i32, %c0_i32_0 : i32, i32, i32
  }
  func.func @transform_13(%arg0: i32, %arg1: i32) -> (i32, i32, i32) {
    %c0_i32 = arith.constant 0 : i32
    %c0_i32_0 = arith.constant 0 : i32
    %c0_i32_1 = arith.constant 0 : i32
    return %arg1, %c0_i32, %c0_i32_0 : i32, i32, i32
  }
  func.func @transform_14(%arg0: i32, %arg1: i32) -> (i32, i32, i32) {
    %c0_i32 = arith.constant 0 : i32
    %c0_i32_0 = arith.constant 0 : i32
    %c0_i32_1 = arith.constant 0 : i32
    return %arg1, %c0_i32, %c0_i32_0 : i32, i32, i32
  }
  func.func @transform_15(%arg0: i32, %arg1: i32) -> (i32, i32, i32) {
    %c0_i32 = arith.constant 0 : i32
    %c0_i32_0 = arith.constant 0 : i32
    %c0_i32_1 = arith.constant 0 : i32
    return %arg1, %c0_i32, %c0_i32_0 : i32, i32, i32
  }
  func.func @transform_16(%arg0: i32, %arg1: i32) -> (i32, i32, i32) {
    %c0_i32 = arith.constant 0 : i32
    %c0_i32_0 = arith.constant 0 : i32
    %c0_i32_1 = arith.constant 0 : i32
    return %arg1, %c0_i32, %c0_i32_0 : i32, i32, i32
  }
  func.func @transform_17(%arg0: i32, %arg1: i32) -> (i32, i32, i32) {
    %c0_i32 = arith.constant 0 : i32
    %c0_i32_0 = arith.constant 0 : i32
    %c0_i32_1 = arith.constant 0 : i32
    return %arg1, %c0_i32, %c0_i32_0 : i32, i32, i32
  }
  func.func @transform_18(%arg0: i32, %arg1: i32) -> (i32, i32, i32) {
    %c0_i32 = arith.constant 0 : i32
    %c0_i32_0 = arith.constant 0 : i32
    %c0_i32_1 = arith.constant 0 : i32
    return %arg0, %c0_i32, %c0_i32_0 : i32, i32, i32
  }
}

</mosaic_0001>

<bundles_post_ra>
// kernel: tpu_custom_call.1
= control target key start
LH: loop header
LB: loop body
LE: loop exit
PB: predicated region body
PF: predicated region fallthrough
CT: control target
= control target key end

     0   :  { %s3287_s0 = inlined_call_operand.hbm [shape: f32[2,8,32], index: 0, kind: input, shape index: {}]   ;;  %s3288_s1 = inlined_call_operand.hbm [shape: f32[2,1,8], index: 1, kind: input, shape index: {}]   ;;  %s3289_s2 = inlined_call_operand.vmem [shape: bf16[2,32,32], index: 2, kind: input, shape index: {}]   ;;  %s3290_s3 = inlined_call_operand.hbm [shape: f32[2,1,32], index: 3, kind: input, shape index: {}]   ;;  %s3291_s4 = inlined_call_operand.vmem [shape: bf16[2,32,32], index: 4, kind: input, shape index: {}]   ;;  %s3292_s5 = inlined_call_operand.vmem [shape: f32[2,1,32], index: 5, kind: input, shape index: {}]   ;;  %s3293_s6 = inlined_call_operand.vmem [shape: bf16[2,32,32], index: 6, kind: input, shape index: {}]   ;;  %s3294_s7 = inlined_call_operand.vmem [shape: f32[2,1,32], index: 7, kind: input, shape index: {}]   ;;  %s3295_s8 = inlined_call_operand.hbm [shape: bf16[2,32,32], index: 8, kind: input, shape index: {}]   ;;  %s3296_s9 = inlined_call_operand.vmem [shape: f32[2,1,32], index: 9, kind: input, shape index: {}]   ;;  %s3297_s10 = inlined_call_operand.vmem [shape: f32[2,1,32], index: 10, kind: input, shape index: {}]   ;;  %s3298_s11 = inlined_call_operand.hbm [shape: f32[2,1,32], index: 11, kind: input, shape index: {}]   ;;  %s3299_s12 = inlined_call_operand.hbm [shape: bf16[2,32,64], index: 12, kind: input, shape index: {}]   ;;  %s3300_s13 = inlined_call_operand.vmem [shape: f32[2,1,64], index: 13, kind: input, shape index: {}]   ;;  %s3301_s14 = inlined_call_operand.vmem [shape: bf16[2,64,32], index: 14, kind: input, shape index: {}]   ;;  %s3302_s15 = inlined_call_operand.vmem [shape: f32[2,1,32], index: 15, kind: input, shape index: {}]   ;;  %s3303_s16 = inlined_call_operand.vmem [shape: f32[2,1,32], index: 16, kind: input, shape index: {}]   ;;  %s3304_s17 = inlined_call_operand.hbm [shape: f32[2,1,32], index: 17, kind: input, shape index: {}]   ;;  %s3305_s18 = inlined_call_operand.hbm [shape: f32[2,8,32], index: 18, kind: output, shape index: {}]  }
   0x1   :  { %3310 = sst [smem:[#allocation22_spill]] %s3287_s0 }
   0x2   :  { %3311 = sst [smem:[#allocation23_spill]] %s3288_s1 }
   0x3   :  { %3312 = sst [smem:[#allocation24_spill]] %s3289_s2 }
   0x4   :  { %3313 = sst [smem:[#allocation25_spill]] %s3290_s3 }
   0x5   :  { %3314 = sst [smem:[#allocation26_spill]] %s3291_s4 }
   0x6   :  { %3315 = sst [smem:[#allocation27_spill]] %s3293_s6 }
   0x7   :  { %3316 = sst [smem:[#allocation28_spill]] %s3294_s7 }
   0x8   :  { %3317 = sst [smem:[#allocation29_spill]] %s3295_s8 }
   0x9   :  { %3318 = sst [smem:[#allocation30_spill]] %s3296_s9 }
   0xa   :  { %3319 = sst [smem:[#allocation31_spill]] %s3297_s10 }
   0xb   :  { %3320 = sst [smem:[#allocation32_spill]] %s3298_s11 }
   0xc   :  { %3321 = sst [smem:[#allocation33_spill]] %s3299_s12 }
   0xd   :  { %3322 = sst [smem:[#allocation34_spill]] %s3300_s13 }
   0xe   :  { %3323 = sst [smem:[#allocation35_spill]] %s3301_s14 }
   0xf   :  { %3324 = sst [smem:[#allocation36_spill]] %s3302_s15 }
  0x10   :  { %3325 = sst [smem:[#allocation37_spill]] %s3303_s16 }
  0x11   :  { %3326 = sst [smem:[#allocation38_spill]] %s3304_s17 }
  0x12   :  { %3327 = sst [smem:[#allocation39_spill]] %s3305_s18 }
  0x13   :  { %23 = vsyncpa [#allocation3], 0 }
  0x14   :  { %24 = vsyncpa [#allocation6], 0 }
  0x15   :  { %25 = vsyncpa [#allocation4], 0  ;;  %s2862_s27 = smov 0   ;;  %s2864_s28 = smov 0  }
  0x16   :  { %s2866_s29 = smov 0   ;;  %s2868_s30 = smov 0  }
  0x17   :  { %s2870_s0 = smov 0   ;;  %s2872_s19 = smov 0  }
  0x18 LB: > { %3328 = sst [smem:[#allocation17_spill]] %s2736_s29  ;;  %s2891_s1 = sadd.s32 4294967295, %s2748_s19   ;;  %s2748_s19 = sphi %s2872_s19, %s31_s19   ;;  %s2744_s0 = sphi %s2870_s0, %s3370_s0   ;;  %s2740_s30 = sphi %s2868_s30, %s3369_s30   ;;  %s2736_s29 = sphi %s2866_s29, %s3368_s29   ;;  %s2732_s28 = sphi %s2864_s28, %s3372_s28   ;;  %s2728_s27 = sphi %s2862_s27, %s3371_s27  }
  0x19   : > { %3329 = sst [smem:[#allocation18_spill]] %s2744_s0  ;;  %p141_p0 = scmp.ne.s32.totalorder %s2732_s28, %s2728_s27 }
  0x1a   : > { %3330 = sst [smem:[#allocation19_spill]] %s2748_s19  ;;  %p142_p1 = scmp.eq.s32.totalorder %s2891_s1, 0 }
  0x1b   : > { %p2136_p2 = scmp.ge.s32.totalorder %s2748_s19, 1  ;;  %p542_p3 = scmp.lt.s32.totalorder %s2748_s19, 3 }
  0x1c   : > { %p2899_p4 = por %p142_p1, %p141_p0  ;;  %s3332_s2 = sld [smem:[#allocation22_spill]] }
  0x1d   : > { %p2906_p5 = pnand %p2136_p2, %p542_p3  ;;  %s2750_s25 = smov [#allocation2]  }
  0x1e   : > { %s558_s26 = sshll.u32 %s2750_s25, 4  ;;  %s2751_s21 = smov 128   ;;  %s559_s26 = int_to_ptr.vmem [resolvable:$true] %s558_s26 }
  0x1f   : > { %p2284_p6 = pneg %p2906_p5  ;;  %s2752_s22 = smov 8  }
  0x20   : > { %s128_s18 = sadd.s32 1, %s2736_s29  ;;  %p135_p9 = scmp.ne.s32.totalorder %s2736_s29, %s2732_s28 }
  0x21   : > { %p2914_p7 = pnand %p2284_p6, %p142_p1  ;;  %p136_p10 = scmp.eq.s32.totalorder %s2748_s19, 0 }
  0x22   : > { %s556_s23 = sshll.u32 %s3332_s2, 4  ;;  %s40_s2 = sadd.s32 1, %s2744_s0  ;;  %s557_s23 = int_to_ptr.hbm [resolvable:$true] %s556_s23 }
  0x23   : > { %2287 = dma.hbm_to_vmem [thread:$0]  (!%p2914_p7), %s557_s23, 256, %s559_s26, [#allocation3], %s2751_s21, %s2751_s21, %s2752_s22  }
  0x24   : > { %p41_p8 = scmp.ge.s32.totalorder %s40_s2, 2  ;;  %p2927_p11 = por %p136_p10, %p135_p9 }
  0x25   : > { %p2309_p12 = scmp.lt.s32.totalorder %s2748_s19, 2  ;;  %s596_s15 = sand.u32 1, %s2748_s19  }
  0x26   : > { %s3374_s2 = smov (%p41_p8, %s40_s2), 0  ;;  %s2936_s14 = sand.u32 1, %s2736_s29  }
  0x27   : > { %3335 = sst [smem:[#allocation20_spill]] %s3374_s2  ;;  %s125_s16 = ssub.s32 %s2744_s0, %s3374_s2 }
  0x28   : > { %p126_p13 = scmp.eq.s32.totalorder %s125_s16, 0  ;;  %s3337_s3 = sld [smem:[#allocation25_spill]] }
  0x29   : > { %s599_s10 = scalar_lea.vmem [#allocation7], %s2936_s14  ;;  %p2948_p0 = pnand %p2309_p12, %p2927_p11 }
  0x2a   : > { %s2943_s22 = scalar_select %p126_p13, %s2736_s29, %s128_s18  }
  0x2b   : > { %s606_s9 = sshll.u32 %s599_s10, 4  ;;  %s2140_s23 = sshll.u32 %s2936_s14, 4  ;;  %s607_s9 = int_to_ptr.vmem [resolvable:$true] %s606_s9 }
  0x2c   : > { %3338 = sst [smem:[#allocation21_spill]] %s2943_s22  ;;  %s2242_s26 = sshll.u32 %s2744_s0, 4 }
  0x2d   : > { %s2954_s2 = scalar_lea.sflag [#allocation3], %s596_s15  ;;  %s3340_s8 = sld [smem:[#allocation29_spill]] }
  0x2e   : > { %s602_s21 = scalar_lea.hbm %s3337_s3, %s2744_s0  ;;  %s2753_s29 = smov 64  }
  0x2f   : > { %s604_s13 = sshll.u32 %s602_s21, 4  ;;  %s645_s21 = scalar_lea.vmem [#allocation8], %s2140_s23  ;;  %s605_s13 = int_to_ptr.hbm [resolvable:$true] %s604_s13 }
  0x30   : > { %2294 = dma.hbm_to_vmem [thread:$0]  (!%p2948_p0), %s605_s13, 16, %s607_s9, %s2954_s2  }
  0x31   : > { %s653_s3 = sshll.u32 %s645_s21, 4  ;;  %s2754_s19 = smov 4   ;;  %s654_s3 = int_to_ptr.vmem [resolvable:$true] %s653_s3 }
  0x32   : > { %s3341_s11 = sld [smem:[#allocation32_spill]]  ;;  %s678_s13 = scalar_lea.vmem [#allocation9], %s2936_s14 }
  0x33   : > { %s650_s25 = scalar_lea.hbm %s3340_s8, %s2242_s26  ;;  %s685_s18 = sshll.u32 %s678_s13, 4  ;;  %s686_s18 = int_to_ptr.vmem [resolvable:$true] %s685_s18 }
  0x34   : > { %s651_s22 = sshll.u32 %s650_s25, 4  ;;  %s3342_s12 = sld [smem:[#allocation33_spill]]  ;;  %s652_s22 = int_to_ptr.hbm [resolvable:$true] %s651_s22 }
  0x35   : > { %2297 = dma.hbm_to_vmem [thread:$0]  (!%p2948_p0), %s652_s22, 256, %s654_s3, %s2954_s2, %s2753_s29, %s2753_s29, %s2754_s19  }
  0x36   : > { %s696_s6 = scalar_lea.vmem [#allocation10], %s2140_s23  ;;  %s3343_s13 = sld [smem:[#allocation23_spill]] }
  0x37   : > { %s704_s3 = sshll.u32 %s696_s6, 4  ;;  %s2756_s25 = smov 16   ;;  %s705_s3 = int_to_ptr.vmem [resolvable:$true] %s704_s3 }
  0x38   : > { %s681_s9 = scalar_lea.hbm %s3341_s11, %s2744_s0  ;;  %s3344_s17 = sld [smem:[#allocation38_spill]] }
  0x39   : > { %s683_s10 = sshll.u32 %s681_s9, 4  ;;  %s743_s11 = scalar_lea.vmem [#allocation11], %s2936_s14  ;;  %s684_s10 = int_to_ptr.hbm [resolvable:$true] %s683_s10 }
  0x3a   : > { %2300 = dma.hbm_to_vmem [thread:$0]  (!%p2948_p0), %s684_s10, 16, %s686_s18, %s2954_s2  }
  0x3b   : > { %s701_s8 = scalar_lea.hbm %s3342_s12, %s2242_s26  ;;  %s2755_s18 = smov [#allocation5]  }
  0x3c   : > { %s702_s22 = sshll.u32 %s701_s8, 4  ;;  %s572_s9 = sshll.u32 %s3343_s13, 4  ;;  %s703_s22 = int_to_ptr.hbm [resolvable:$true] %s702_s22  ;;  %s573_s9 = int_to_ptr.hbm [resolvable:$true] %s572_s9 }
  0x3d   : > { %2303 = dma.hbm_to_vmem [thread:$0]  (!%p2948_p0), %s703_s22, 256, %s705_s3, %s2954_s2, %s2753_s29, %s2753_s29, %s2754_s19  }
  0x3e   : > { %s574_s10 = sshll.u32 %s2755_s18, 4  ;;  %s2757_s26 = smov 1   ;;  %s575_s10 = int_to_ptr.vmem [resolvable:$true] %s574_s10 }
  0x3f   : > { %2290 = dma.hbm_to_vmem [thread:$0]  (!%p2914_p7), %s573_s9, 32, %s575_s10, [#allocation6], %s2756_s25, %s2756_s25, %s2757_s26  }
  0x40   : > { %s746_s23 = scalar_lea.hbm %s3344_s17, %s2744_s0  ;;  %s750_s7 = sshll.u32 %s743_s11, 4  ;;  %s751_s7 = int_to_ptr.vmem [resolvable:$true] %s750_s7 }
  0x41   : > { %s748_s21 = sshll.u32 %s746_s23, 4  ;;  %759 = sbr.rel (%p2906_p5) target bundleno = 2030 (0x7ee), region = 92  ;;  %s749_s21 = int_to_ptr.hbm [resolvable:$true] %s748_s21 }
  0x42   : > { %2306 = dma.hbm_to_vmem [thread:$0]  (!%p2948_p0), %s749_s21, 16, %s751_s7, %s2954_s2  }
  0x46   : > { %2711 = dma.done.wait (%p142_p1), [#allocation3], 256  }
  0x47   : > { %2713 = vsyncadd (%p142_p1), [#allocation3], 4294967040 }
  0x48   : > { %2715 = dma.done.wait (%p142_p1), [#allocation6], 32  }
  0x49   : > { %2717 = vsyncadd (%p142_p1), [#allocation6], 4294967264  ;;  %s771_s11 = sand.u32 1, %s2891_s1   ;;  %s3004_s14 = sand.u32 1, %s2732_s28  }
  0x4a   : > { %s772_s29 = scalar_lea.sflag [#allocation3], %s771_s11 }
  0x4b   : > { %2719 = dma.done.wait (%p2899_p4), %s772_s29, 560  }
  0x4c   : > { %2721 = vsyncadd (%p2899_p4), %s772_s29, 4294966736  ;;  %s2149_s24 = sshll.u32 %s3004_s14, 4  ;;  %p921_p2 = scmp.lt.s32.totalorder %s2740_s30, 1 }
  0x4d   : > { %s3345_s13 = sld [smem:[#allocation24_spill]]  ;;  %s3062_s12 = scalar_lea.vmem [#allocation8], %s2149_s24 }
  0x4e   : > { %s3014_s27 = scalar_select %p921_p2, %s2740_s30, 1 }
  0x4f   : > { %s3346_s4 = sld [smem:[#allocation26_spill]]  ;;  %s793_s22 = scalar_lea.vmem [#allocation9], %s3004_s14 }
  0x50   : > { %s2244_s2 = sshll.u32 %s3014_s27, 4  ;;  %s3347_s8 = sld [smem:[#allocation27_spill]] }
  0x51   : > { %s3350_s15 = sld [smem:[#allocation31_spill]]  ;;  %s2247_s0 = sshll.u32 %s3014_s27, 5 }
  0x52   : > { %s3351_s10 = sld [smem:[#allocation34_spill]]  ;;  %s812_s17 = scalar_lea.vmem [#allocation11], %s3004_s14 }
  0x53   : > { %s925_s9 = scalar_lea.vmem %s3345_s13, %s2244_s2  ;;  %s3352_s6 = sld [smem:[#allocation35_spill]] }
  0x54   : > { %s3353_s11 = sld [smem:[#allocation36_spill]]  ;;  %p2159_p1 = scmp.ne.s32.totalorder %s2740_s30, 0 }
  0x55   : > { %s930_s25 = scalar_lea.vmem %s3346_s4, %s2244_s2  ;;  %s3354_s16 = sld [smem:[#allocation37_spill]] }
  0x56   : > { %s3030_s23 = scalar_lea.vmem %s3347_s8, %s2244_s2 }
  0x57   : > { %s947_s13 = scalar_lea.vmem %s3350_s15, %s3014_s27  ;;  %s3065_s15 = scalar_lea.vmem [#allocation10], %s2149_s24 }
  0x58   : > { %s950_s4 = scalar_lea.vmem %s3351_s10, %s3014_s27  ;;  %967 = sbr.rel (%p2159_p1) target bundleno = 96 (0x60), region = 124 }
  0x59   : > { %s3052_s8 = scalar_lea.vmem %s3352_s6, %s2247_s0 }
  0x5a   : > { %s958_s29 = scalar_lea.vmem %s3353_s11, %s3014_s27 }
  0x5b   : > { %s961_s19 = scalar_lea.vmem %s3354_s16, %s3014_s27 }
  0x5d   : > { %v968_v0 = vld [vmem:[#allocation2] sm:$0xff]  ;;  %vm970_vm0 = vcmask 261120   ;;  %v969_v1 = vld [vmem:[#allocation2 + $0x8] sm:$0xff] }
  0x5e   : > { %971 = vst.msk [vmem:[#allocation12] sm:$0xff] %vm970_vm0, %v968_v0 }
  0x5f   : > { %972 = vst.msk [vmem:[#allocation12 + $0x8] sm:$0xff] %vm970_vm0, %v969_v1 }
  0x60 PF: > { %v2249_v2 = vld [vmem:[%s925_s9 + $0x8] sm:$0xff]  ;;  %v2248_v4 = vld [vmem:[%s925_s9] sm:$0xff]  ;;  %vm998_vm1 = vcmask 261120   ;;  %s3355_s30 = scalar_lea.vmem [#allocation7], %s3004_s14  ;;  %s3356_s9 = scalar_lea.vmem %s3292_s5, %s3014_s27  ;;  %vm1090_vm2 = vcmask 64512   ;;  %vm1166_vm3 = vcmask 1043456  }
  0x61   : > { %v2251_v3 = vld [vmem:[%s930_s25 + $0x8] sm:$0xff]  ;;  %v2250_v5 = vld [vmem:[%s930_s25] sm:$0xff]  ;;  %1008 = vmatpush.bf16.msra.mxu0 %v2249_v2  ;;  %s2758_s25 = smov 112   ;;  %s2759_s18 = smov 120   ;;  %v3113_v48 = vld [vmem:[#allocation5] ss:$0 sm:$0xff] }
  0x62   : > { %1042 = vmatpush.bf16.msra.mxu1 %v2251_v3  ;;  %v2394_v9 = vld [vmem:[%s3355_s30] ss:$0 sm:$0xff]  ;;  %s2760_s10 = smov 104   ;;  %v2253_v46 = vld [vmem:[%s3030_s23 + $0x8] sm:$0xff]  ;;  %v3115_v51 = vld [vmem:[#allocation5 + $0x1] ss:$0 sm:$0xff] }
  0x63   : > { %v2395_v10 = vld [vmem:[%s3356_s9] ss:$0 sm:$0xff]  ;;  %1076 = vmatpush.bf16.msra.mxu2 %v2253_v46  ;;  %s3357_s2 = sld [smem:[#allocation28_spill]]  ;;  %s2761_s21 = smov 8   ;;  %vm1594_vm4 = vcmask 130048   ;;  %vm1597_vm5 = vcmask 195584  }
  0x64   : > { %v2252_v47 = vld [vmem:[%s3030_s23] sm:$0xff]  ;;  %s2762_s7 = smov 16   ;;  %s2763_s11 = smov 24   ;;  %vm1780_vm13 = vcmask 523264  }
  0x65   : > { %v3069_v6 = vld [vmem:[#allocation12] sm:$0xff]  ;;  %1009 = vmatpush.bf16.msra.mxu0 %v2248_v4  ;;  %s3359_s16 = sld [smem:[#allocation30_spill]]  ;;  %p2312_p3 = scmp.eq.s32.totalorder %s2891_s1, 1 }
  0x66   : > { %v3071_v7 = vld [vmem:[#allocation12 + $0x8] sm:$0xff]  ;;  %1043 = vmatpush.bf16.msra.mxu1 %v2250_v5  ;;  %s3365_s14 = sld [smem:[#allocation39_spill]]  ;;  %s2766_s26 = smov 128  }
  0x67   : > { %v3075_v8 = vpack.c.bf16 %v3071_v7, %v3069_v6  ;;  %1077 = vmatpush.bf16.msra.mxu2 %v2252_v47 }
  0x69   : > { %2168 = vmatmul.msk.bf16.vlgmr.msra.gmra.mxu0 %vm998_vm1, %v3075_v8  ;;  %2177 = vmatmul.msk.bf16.vlgmr.msra.gmra.mxu1 %vm998_vm1, %v3075_v8  ;;  %s3358_s6 = scalar_lea.vmem %s3357_s2, %s3014_s27 }
  0x6a   : > { %2186 = vmatmul.msk.bf16.vlgmr.msra.gmra.mxu2 %vm998_vm1, %v3075_v8 }
  0xe6   : > { %v1011_v11 = vpop.f32.mrf.mxu0  ;;  %v1045_v12 = vpop.f32.mrf.mxu1 }
  0xe7   : > { %v1012_v13 = vadd.f32 %v2394_v9, %v1011_v11  ;;  %v1046_v14 = vadd.f32 %v2395_v10, %v1045_v12 }
  0xe9   : > { %v1084_v15 = vpack.c.bf16 %v1012_v13, %v1012_v13  ;;  %v1086_v16 = vpack.c.bf16 %v1046_v14, %v1046_v14 }
  0xeb   : > { %v1203_v17 = vunpack.c.l.b16 %v1084_v15  ;;  %v1208_v18 = vunpack.c.l.b16 %v1086_v16  ;;  %v1095_v19 = vsel %vm1090_vm2, %v1086_v16, 0 }
  0xec   : > { %1104 = vmatpush.bf16.xpose.msra.mxu3 %v1095_v19 }
  0xed   : > { %v1204_v20 = vpack.c.b16 %v1203_v17, %v1203_v17  ;;  %v1209_v21 = vpack.c.b16 %v1208_v18, %v1208_v18  ;;  %v2398_v18 = vld [vmem:[%s3358_s6] ss:$0 sm:$0xff] }
  0xee   : > { %v1013_v22 = vpop.f32.mrf.mxu0  ;;  %v1047_v23 = vpop.f32.mrf.mxu1 }
  0xef   : > { %v1014_v24 = vadd.f32 %v2394_v9, %v1013_v22  ;;  %v1048_v25 = vadd.f32 %v2395_v10, %v1047_v23  ;;  %1338 = vrot.lane.b32.xlu2 %v1209_v21, %s2758_s25  ;;  %1210 = vrot.lane.b32.xlu0 %v1209_v21, %s2759_s18 }
  0xf0   : > { %1205 = vrot.lane.b32.xlu1 %v1204_v20, %s2759_s18 }
  0xf1   : > { %v1085_v26 = vpack.c.bf16 %v1014_v24, %v1014_v24  ;;  %v1087_v27 = vpack.c.bf16 %v1048_v25, %v1048_v25  ;;  %v1079_v24 = vpop.f32.mrf.mxu2 }
  0xf3   : > { %v1232_v28 = vunpack.c.l.b16 %v1085_v26  ;;  %v1237_v29 = vunpack.c.l.b16 %v1087_v27  ;;  %2187 = vmatmul.msk.bf16.vlgmr.msra.gmra.mxu3 %vm1090_vm2, %v1084_v15  ;;  %v1114_v30 = vsel %vm1090_vm2, %v1087_v27, 0 }
  0xf4   : > { %1123 = vmatpush.bf16.xpose.msrb.mxu0 %v1114_v30 }
  0xf5   : > { %v1233_v31 = vpack.c.b16 %v1232_v28, %v1232_v28  ;;  %v1238_v32 = vpack.c.b16 %v1237_v29, %v1237_v29 }
  0xf7   : > { %1361 = vrot.lane.b32.xlu2 %v1238_v32, %s2758_s25  ;;  %1239 = vrot.lane.b32.xlu0 %v1238_v32, %s2759_s18 }
  0xf8   : > { %1234 = vrot.lane.b32.xlu1 %v1233_v31, %s2759_s18 }
  0xfb   : > { %2188 = vmatmul.msk.bf16.vlgmr.msrb.gmra.mxu0 %vm1090_vm2, %v1085_v26  ;;  %v1080_v26 = vadd.f32 %v2398_v18, %v1079_v24 }
  0xfd   : > { %v1088_v30 = vpack.c.bf16 %v1080_v26, %v1080_v26 }
  0xff   : > { %1454 = vrot.lane.b32.xlu2 %v1209_v21, %s2760_s10  ;;  %1336 = vrot.lane.b32.xlu0 %v1204_v20, %s2758_s25 }
 0x100   : > { %1359 = vrot.lane.b32.xlu1 %v1233_v31, %s2758_s25 }
 0x107   : > { %1475 = vrot.lane.b32.xlu2 %v1233_v31, %s2760_s10  ;;  %1477 = vrot.lane.b32.xlu0 %v1238_v32, %s2760_s10 }
 0x108   : > { %1452 = vrot.lane.b32.xlu1 %v1204_v20, %s2760_s10 }
 0x149   : > { %v1339_v33 = vpop.permute.xlu2 %1338 }
 0x14a   : > { %v1344_v37 = vsel %vm1090_vm2, %v1339_v33, 0  ;;  %v1168_v33 = vsel %vm1166_vm3, %v1088_v30, 0 }
 0x14b   : > { %1177 = vmatpush.bf16.msrb.mxu1 %v1168_v33 }
 0x151   : > { %v1362_v34 = vpop.permute.xlu2 %1361 }
 0x152   : > { %v1367_v43 = vsel %vm1090_vm2, %v1362_v34, 0 }
 0x159   : > { %v1455_v38 = vpop.permute.xlu2 %1454 }
 0x15a   : > { %v1460_v41 = vsel %vm1090_vm2, %v1455_v38, 0 }
 0x161   : > { %v1211_v35 = vpop.permute.xlu0 %1210  ;;  %v1476_v0 = vpop.permute.xlu2 %1475 }
 0x162   : > { %v1216_v36 = vsel %vm1090_vm2, %v1211_v35, 0  ;;  %v1206_v39 = vpop.permute.xlu1 %1205 }
 0x163   : > { %1225 = vmatpush.bf16.xpose.msrb.mxu3 %v1216_v36 }
 0x169   : > { %v1240_v40 = vpop.permute.xlu0 %1239 }
 0x16a   : > { %v1245_v42 = vsel %vm1090_vm2, %v1240_v40, 0  ;;  %2191 = vmatmul.msk.bf16.vlgmr.msrb.gmra.mxu3 %vm1090_vm2, %v1206_v39  ;;  %v1235_v44 = vpop.permute.xlu1 %1234 }
 0x16b   : > { %1353 = vmatpush.bf16.xpose.msra.mxu3 %v1344_v37  ;;  %1254 = vmatpush.bf16.xpose.msra.mxu0 %v1245_v42  ;;  %v1081_v37 = vpop.f32.mrf.mxu2 }
 0x16c   : > { %v1082_v39 = vadd.f32 %v2398_v18, %v1081_v37 }
 0x16e   : > { %v1089_v40 = vpack.c.bf16 %v1082_v39, %v1082_v39 }
 0x171   : > { %v1337_v45 = vpop.permute.xlu0 %1336 }
 0x172   : > { %2192 = vmatmul.msk.bf16.vlgmr.msra.gmra.mxu0 %vm1090_vm2, %v1235_v44  ;;  %v1360_v61 = vpop.permute.xlu1 %1359 }
 0x173   : > { %1469 = vmatpush.bf16.xpose.msrb.mxu3 %v1460_v41  ;;  %1376 = vmatpush.bf16.xpose.msrb.mxu0 %v1367_v43  ;;  %v1187_v41 = vsel %vm1166_vm3, %v1089_v40, 0 }
 0x174   : > { %1196 = vmatpush.bf16.msrb.mxu2 %v1187_v41 }
 0x176   : > { %v1106_v49 = vpop.f32.mrf.mxu3 }
 0x177   : > { %v1129_v50 = vmul.f32 0.35355338, %v1106_v49 }
 0x178   : > { %v1125_v52 = vpop.f32.mrf.mxu0 }
 0x179   : > { %v1130_v53 = vmul.f32 0.35355338, %v1125_v52  ;;  %v1478_v54 = vpop.permute.xlu0 %1477  ;;  %v1137_v55 = vadd.f32 %v3113_v48, %v1129_v50  ;;  %v1289_v50 = vunpack.c.l.b16 %v1088_v30 }
 0x17a   : > { %v1483_v56 = vsel %vm1090_vm2, %v1478_v54, 0  ;;  %2195 = vmatmul.msk.bf16.vlgmr.msra.gmra.mxu3 %vm1090_vm2, %v1337_v45  ;;  %v1453_v63 = vpop.permute.xlu1 %1452 }
 0x17b   : > { %1492 = vmatpush.bf16.xpose.msra.mxu0 %v1483_v56  ;;  %v1139_v57 = vsel %vm1090_vm2, %v1137_v55, -inf  ;;  %v1138_v58 = vadd.f32 %v3115_v51, %v1130_v53  ;;  %v3164_v54 = vpack.c.b16 %v1289_v50, %v1289_v50  ;;  %v1313_v56 = vunpack.c.l.b16 %v1089_v40 }
 0x17c   : > { %1140 = vmax.xlane.f32.xlu1 %v1139_v57 }
 0x17d   : > { %v1142_v59 = vsel %vm1090_vm2, %v1138_v58, -inf }
 0x17e   : > { %1143 = vmax.xlane.f32.xlu0 %v1142_v59  ;;  %v1108_v60 = vpop.f32.mrf.mxu3 }
 0x180   : > { %v1127_v62 = vpop.f32.mrf.mxu0 }
 0x182   : > { %2196 = vmatmul.msk.bf16.vlgmr.msrb.gmra.mxu0 %vm1090_vm2, %v1360_v61 }
 0x18a   : > { %2199 = vmatmul.msk.bf16.vlgmr.msrb.gmra.mxu3 %vm1090_vm2, %v1453_v63 }
 0x192   : > { %2200 = vmatmul.msk.bf16.vlgmr.msra.gmra.mxu0 %vm1090_vm2, %v1476_v0 }
 0x1ed   : > { %v1227_v1 = vpop.f32.mrf.mxu3 }
 0x1ee   : > { %v1260_v11 = vmul.f32 0.35355338, %v1227_v1 }
 0x1ef   : > { %v1256_v2 = vpop.f32.mrf.mxu0  ;;  %v1141_v4 = vpop.xlane.xlu1 %1140 }
 0x1f0   : > { %v1261_v3 = vmul.f32 0.35355338, %v1256_v2  ;;  %v1145_v10 = vsub.f32 %v1137_v55, %v1141_v4  ;;  %v1262_v17 = vadd.f32 %v3113_v48, %v1260_v11 }
 0x1f1   : > { %v1144_v5 = vpop.xlane.xlu0 %1143 }
 0x1f2   : > { %v1146_v8 = vsub.f32 %v1138_v58, %v1144_v5  ;;  %v3129_v9 = vadd.f32 %v3115_v51, %v1261_v3  ;;  %v1147_v15 = vmul.f32 1.442695, %v1145_v10  ;;  %v1264_v20 = vsel %vm1090_vm2, %v1262_v17, -inf }
 0x1f4   : > { %v1149_v12 = vmul.f32 1.442695, %v1146_v8  ;;  %v1267_v13 = vsel %vm1090_vm2, %v3129_v9, -inf }
 0x1f5   : > { %1268 = vmax.xlane.f32.xlu2 %v1267_v13  ;;  %v1229_v14 = vpop.f32.mrf.mxu3 }
 0x1f6   : > { %2406 = vpow2.f32 %v1149_v12 }
 0x1f7   : > { %v1258_v16 = vpop.f32.mrf.mxu0  ;;  %2408 = vpow2.f32 %v1147_v15 }
 0x1fc   : > { %v3139_v19 = vpop.eup %2406 }
 0x1fd   : > { %1265 = vmax.xlane.f32.xlu2 %v1264_v20  ;;  %v1355_v21 = vpop.f32.mrf.mxu3  ;;  %v1154_v22 = vsel %vm1090_vm2, %v3139_v19, 0.0  ;;  %v3145_v29 = vpop.eup %2408 }
 0x1fe   : > { %v1382_v23 = vmul.f32 0.35355338, %v1355_v21  ;;  %1155 = vadd.xlane.f32.xlu0 %v1154_v22  ;;  %v1151_v34 = vsel %vm1090_vm2, %v3145_v29, 0.0 }
 0x1ff   : > { %v1378_v25 = vpop.f32.mrf.mxu0 }
 0x200   : > { %v1383_v27 = vmul.f32 0.35355338, %v1378_v25  ;;  %v1384_v28 = vadd.f32 %v3113_v48, %v1382_v23 }
 0x202   : > { %v1386_v31 = vsel %vm1090_vm2, %v1384_v28, -inf  ;;  %v3149_v32 = vadd.f32 %v3115_v51, %v1383_v27 }
 0x203   : > { %1387 = vmax.xlane.f32.xlu1 %v1386_v31 }
 0x204   : > { %v1389_v35 = vsel %vm1090_vm2, %v3149_v32, -inf }
 0x205   : > { %1152 = vadd.xlane.f32.xlu2 %v1151_v34  ;;  %v1357_v36 = vpop.f32.mrf.mxu3 }
 0x206   : > { %1390 = vmax.xlane.f32.xlu0 %v1389_v35 }
 0x207   : > { %v1380_v38 = vpop.f32.mrf.mxu0 }
 0x20d   : > { %v1471_v42 = vpop.f32.mrf.mxu3 }
 0x20e   : > { %v1498_v43 = vmul.f32 0.35355338, %v1471_v42 }
 0x20f   : > { %v1494_v44 = vpop.f32.mrf.mxu0 }
 0x210   : > { %v1499_v45 = vmul.f32 0.35355338, %v1494_v44  ;;  %v3158_v46 = vadd.f32 %v3113_v48, %v1498_v43  ;;  %v1314_v48 = vpack.c.b16 %v1313_v56, %v1313_v56 }
 0x212   : > { %v1502_v47 = vsel %vm1090_vm2, %v3158_v46, -inf  ;;  %v1501_v49 = vadd.f32 %v3115_v51, %v1499_v45 }
 0x213   : > { %1503 = vmax.xlane.f32.xlu1 %v1502_v47 }
 0x214   : > { %v1505_v52 = vsel %vm1090_vm2, %v1501_v49, -inf }
 0x215   : > { %1506 = vmax.xlane.f32.xlu2 %v1505_v52  ;;  %v1473_v53 = vpop.f32.mrf.mxu3 }
 0x217   : > { %v1496_v55 = vpop.f32.mrf.mxu0 }
 0x21a   : > { %1291 = vrot.lane.b32.xlu0 %v3164_v54, %s2759_s18 }
 0x22c   : > { %1431 = vrot.lane.b32.xlu1 %v1314_v48, %s2758_s25 }
 0x22d   : > { %1315 = vrot.lane.b32.xlu2 %v1314_v48, %s2759_s18 }
 0x268   : > { %v1269_v57 = vpop.xlane.xlu2 %1268 }
 0x269   : > { %v1271_v51 = vsub.f32 %v3129_v9, %v1269_v57 }
 0x26b   : > { %v1274_v58 = vmul.f32 1.442695, %v1271_v51 }
 0x26d   : > { %2410 = vpow2.f32 %v1274_v58 }
 0x270   : > { %v1266_v59 = vpop.xlane.xlu2 %1265 }
 0x271   : > { %v1270_v60 = vsub.f32 %v1262_v17, %v1266_v59  ;;  %v1156_v61 = vpop.xlane.xlu0 %1155 }
 0x272   : > { %2412 = vrcp.f32 %v1156_v61 }
 0x273   : > { %v2411_v62 = vpop.eup %2410  ;;  %v1272_v63 = vmul.f32 1.442695, %v1270_v60 }
 0x274   : > { %v1279_v0 = vsel %vm1090_vm2, %v2411_v62, 0.0 }
 0x275   : > { %2414 = vpow2.f32 %v1272_v63  ;;  %1280 = vadd.xlane.f32.xlu0 %v1279_v0 }
 0x276   : > { %v1388_v1 = vpop.xlane.xlu1 %1387 }
 0x277   : > { %v1392_v2 = vsub.f32 %v1384_v28, %v1388_v1 }
 0x278   : > { %v2413_v3 = vpop.eup %2412  ;;  %v1153_v4 = vpop.xlane.xlu2 %1152 }
 0x279   : > { %v1160_v5 = vmul.f32 %v2413_v3, %v3139_v19  ;;  %v1394_v8 = vmul.f32 1.442695, %v1392_v2  ;;  %2416 = vrcp.f32 %v1153_v4  ;;  %v1391_v9 = vpop.xlane.xlu0 %1390 }
 0x27a   : > { %v1393_v11 = vsub.f32 %v3149_v32, %v1391_v9 }
 0x27b   : > { %v2415_v10 = vpop.eup %2414  ;;  %2418 = vpow2.f32 %v1394_v8  ;;  %v1162_v12 = vpack.c.bf16 %v1160_v5, %v1160_v5 }
 0x27c   : > { %v1276_v13 = vsel %vm1090_vm2, %v2415_v10, 0.0  ;;  %v1396_v15 = vmul.f32 1.442695, %v1393_v11 }
 0x27d   : > { %2190 = vmatmul.msk.bf16.vlgmr.msrb.gmra.mxu2 %vm1090_vm2, %v1162_v12  ;;  %1277 = vadd.xlane.f32.xlu1 %v1276_v13 }
 0x27e   : > { %2420 = vpow2.f32 %v1396_v15 }
 0x27f   : > { %v2417_v14 = vpop.eup %2416 }
 0x280   : > { %v1159_v16 = vmul.f32 %v2417_v14, %v3145_v29 }
 0x281   : > { %v2419_v17 = vpop.eup %2418 }
 0x282   : > { %v1161_v18 = vpack.c.bf16 %v1159_v16, %v1159_v16  ;;  %v1398_v19 = vsel %vm1090_vm2, %v2419_v17, 0.0 }
 0x284   : > { %2189 = vmatmul.msk.bf16.vlgmr.msrb.gmra.mxu1 %vm1090_vm2, %v1161_v18  ;;  %v2421_v21 = vpop.eup %2420 }
 0x285   : > { %1399 = vadd.xlane.f32.xlu1 %v1398_v19  ;;  %v1401_v24 = vsel %vm1090_vm2, %v2421_v21, 0.0 }
 0x286   : > { %v1504_v31 = vpop.xlane.xlu1 %1503 }
 0x287   : > { %v1508_v34 = vsub.f32 %v3158_v46, %v1504_v31 }
 0x288   : > { %v1507_v20 = vpop.xlane.xlu2 %1506 }
 0x289   : > { %v1509_v22 = vsub.f32 %v1501_v49, %v1507_v20  ;;  %1410 = vrot.lane.b32.xlu0 %v3164_v54, %s2758_s25  ;;  %v1510_v35 = vmul.f32 1.442695, %v1508_v34 }
 0x28b   : > { %v1512_v23 = vmul.f32 1.442695, %v1509_v22 }
 0x28c   : > { %v1292_v28 = vpop.permute.xlu0 %1291 }
 0x28d   : > { %2422 = vpow2.f32 %v1512_v23  ;;  %1402 = vadd.xlane.f32.xlu1 %v1401_v24  ;;  %v1297_v30 = vsel %vm1166_vm3, %v1292_v28, 0 }
 0x28e   : > { %1306 = vmatpush.bf16.msra.mxu1 %v1297_v30  ;;  %2424 = vpow2.f32 %v1510_v35 }
 0x290   : > { %v1316_v25 = vpop.permute.xlu2 %1315 }
 0x291   : > { %v1321_v26 = vsel %vm1166_vm3, %v1316_v25, 0  ;;  %v2255_v25 = vld [vmem:[%s3062_s12 + $0x8] sm:$0xff] }
 0x292   : > { %1330 = vmatpush.bf16.msra.mxu2 %v1321_v26  ;;  %1630 = vmatpush.bf16.msra.mxu3 %v2255_v25  ;;  %v2254_v26 = vld [vmem:[%s3062_s12] sm:$0xff]  ;;  %s3360_s12 = scalar_lea.vmem %s3359_s16, %s3014_s27  ;;  %v2400_v25 = vld [vmem:[%s947_s13] ss:$0 sm:$0xff] }
 0x293   : > { %v2423_v27 = vpop.eup %2422 }
 0x294   : > { %v1517_v29 = vsel %vm1090_vm2, %v2423_v27, 0.0  ;;  %v2425_v36 = vpop.eup %2424 }
 0x295   : > { %1518 = vadd.xlane.f32.xlu2 %v1517_v29  ;;  %v1514_v37 = vsel %vm1090_vm2, %v2425_v36, 0.0 }
 0x296   : > { %1631 = vmatpush.bf16.msra.mxu3 %v2254_v26 }
 0x29e   : > { %v1432_v32 = vpop.permute.xlu1 %1431 }
 0x29f   : > { %v1437_v33 = vsel %vm1166_vm3, %v1432_v32, 0 }
 0x2a0   : > { %1446 = vmatpush.bf16.msrb.mxu2 %v1437_v33 }
 0x2a6   : > { %1547 = vrot.lane.b32.xlu1 %v1314_v48, %s2760_s10 }
 0x2ae   : > { %1526 = vrot.lane.b32.xlu1 %v3164_v54, %s2760_s10 }
 0x2b3   : > { %1515 = vadd.xlane.f32.xlu0 %v1514_v37 }
 0x2e8   : > { %v1281_v38 = vpop.xlane.xlu0 %1280 }
 0x2e9   : > { %2426 = vrcp.f32 %v1281_v38 }
 0x2ef   : > { %v2427_v39 = vpop.eup %2426 }
 0x2f0   : > { %v1285_v40 = vmul.f32 %v2427_v39, %v2411_v62  ;;  %v1278_v41 = vpop.xlane.xlu1 %1277 }
 0x2f1   : > { %2428 = vrcp.f32 %v1278_v41 }
 0x2f2   : > { %v1287_v42 = vpack.c.bf16 %v1285_v40, %v1285_v40 }
 0x2f4   : > { %2194 = vmatmul.msk.bf16.vlgmr.msra.gmra.mxu2 %vm1090_vm2, %v1287_v42 }
 0x2f7   : > { %v2429_v43 = vpop.eup %2428 }
 0x2f8   : > { %v1284_v44 = vmul.f32 %v2429_v43, %v2415_v10  ;;  %v1400_v45 = vpop.xlane.xlu1 %1399  ;;  %v2399_v43 = vld [vmem:[%s3360_s12] ss:$0 sm:$0xff] }
 0x2f9   : > { %2430 = vrcp.f32 %v1400_v45 }
 0x2fa   : > { %v1286_v46 = vpack.c.bf16 %v1284_v44, %v1284_v44 }
 0x2fb   : > { %v1411_v47 = vpop.permute.xlu0 %1410 }
 0x2fc   : > { %v1416_v49 = vsel %vm1166_vm3, %v1411_v47, 0  ;;  %2193 = vmatmul.msk.bf16.vlgmr.msra.gmra.mxu1 %vm1090_vm2, %v1286_v46 }
 0x2fd   : > { %1425 = vmatpush.bf16.msrb.mxu1 %v1416_v49 }
 0x2ff   : > { %v2431_v54 = vpop.eup %2430 }
 0x300   : > { %v1198_v50 = vpop.f32.mrf.mxu2  ;;  %v1403_v52 = vpop.xlane.xlu1 %1402  ;;  %v1406_v55 = vmul.f32 %v2431_v54, %v2419_v17  ;;  %v2764_v54 = vmov 32.0  }
 0x301   : > { %2432 = vrcp.f32 %v1403_v52  ;;  %v1179_v53 = vpop.f32.mrf.mxu1 }
 0x302   : > { %v1408_v58 = vpack.c.bf16 %v1406_v55, %v1406_v55 }
 0x307   : > { %v2433_v56 = vpop.eup %2432 }
 0x308   : > { %v1407_v48 = vmul.f32 %v2433_v56, %v2421_v21  ;;  %v1200_v57 = vpop.f32.mrf.mxu2  ;;  %v1519_v60 = vpop.xlane.xlu2 %1518 }
 0x309   : > { %v1181_v51 = vpop.f32.mrf.mxu1  ;;  %2434 = vrcp.f32 %v1519_v60 }
 0x30a   : > { %v1409_v59 = vpack.c.bf16 %v1407_v48, %v1407_v48 }
 0x30c   : > { %2197 = vmatmul.msk.bf16.vlgmr.msrb.gmra.mxu1 %vm1090_vm2, %v1408_v58  ;;  %2198 = vmatmul.msk.bf16.vlgmr.msrb.gmra.mxu2 %vm1090_vm2, %v1409_v59 }
 0x30f   : > { %v2435_v61 = vpop.eup %2434 }
 0x310   : > { %v1523_v62 = vmul.f32 %v2435_v61, %v2423_v27 }
 0x312   : > { %v1525_v1 = vpack.c.bf16 %v1523_v62, %v1523_v62 }
 0x318   : > { %v1548_v63 = vpop.permute.xlu1 %1547 }
 0x319   : > { %v1553_v0 = vsel %vm1166_vm3, %v1548_v63, 0 }
 0x31a   : > { %1562 = vmatpush.bf16.msra.mxu2 %v1553_v0 }
 0x31d   : > { %2202 = vmatmul.msk.bf16.vlgmr.msra.gmra.mxu2 %vm1090_vm2, %v1525_v1 }
 0x320   : > { %v1527_v2 = vpop.permute.xlu1 %1526 }
 0x321   : > { %v1532_v3 = vsel %vm1166_vm3, %v1527_v2, 0 }
 0x322   : > { %1541 = vmatpush.bf16.msra.mxu1 %v1532_v3  ;;  %v2257_v3 = vld [vmem:[%s3065_s15 + $0x8] sm:$0xff] }
 0x323   : > { %1733 = vmatpush.bf16.msrb.mxu0 %v2257_v3 }
 0x326   : > { %v1516_v4 = vpop.xlane.xlu0 %1515 }
 0x327   : > { %2436 = vrcp.f32 %v1516_v4 }
 0x328   : > { %2438 = vrcp.f32 %v2764_v54 }
 0x32d   : > { %v2437_v5 = vpop.eup %2436 }
 0x32e   : > { %v1522_v8 = vmul.f32 %v2437_v5, %v2425_v36  ;;  %v2439_v55 = vpop.eup %2438 }
 0x32f   : > { %v1649_v56 = vmul.f32 32.0, %v2439_v55  ;;  %vm1653_vm6 = vweird.f32 %v2439_v55 }
 0x330   : > { %v1524_v9 = vpack.c.bf16 %v1522_v8, %v1522_v8 }
 0x331   : > { %v1650_v48 = vsub.f32 1.0, %v1649_v56 }
 0x332   : > { %2201 = vmatmul.msk.bf16.vlgmr.msra.gmra.mxu1 %vm1090_vm2, %v1524_v9  ;;  %v2256_v9 = vld [vmem:[%s3065_s15] sm:$0xff] }
 0x333   : > { %v1651_v57 = vmul.f32 %v2439_v55, %v1650_v48  ;;  %1734 = vmatpush.bf16.msrb.mxu0 %v2256_v9 }
 0x335   : > { %v1652_v51 = vadd.f32 %v2439_v55, %v1651_v57 }
 0x377   : > { %v1332_v10 = vpop.f32.mrf.mxu2 }
 0x379   : > { %v1308_v11 = vpop.f32.mrf.mxu1 }
 0x37a   : > { %v2379_v12 = vpack.i.bf16 %v1332_v10, %v1308_v11 }
 0x37c   : > { %2380 = vrot.lane.b32.xlu1 %v2379_v12, %s2761_s21 }
 0x37f   : > { %v1334_v13 = vpop.f32.mrf.mxu2 }
 0x381   : > { %v1310_v14 = vpop.f32.mrf.mxu1 }
 0x389   : > { %v1427_v15 = vpop.f32.mrf.mxu1 }
 0x38f   : > { %v1448_v16 = vpop.f32.mrf.mxu2 }
 0x390   : > { %v2384_v17 = vpack.i.bf16 %v1448_v16, %v1427_v15 }
 0x391   : > { %v1429_v18 = vpop.f32.mrf.mxu1 }
 0x392   : > { %2385 = vrot.lane.b32.xlu2 %v2384_v17, %s2762_s7 }
 0x397   : > { %v1450_v19 = vpop.f32.mrf.mxu2 }
 0x3a0   : > { %v1564_v20 = vpop.f32.mrf.mxu2 }
 0x3a8   : > { %v1566_v21 = vpop.f32.mrf.mxu2 }
 0x3af   : > { %v1543_v22 = vpop.f32.mrf.mxu1 }
 0x3b0   : > { %v2389_v23 = vpack.i.bf16 %v1564_v20, %v1543_v22 }
 0x3b2   : > { %2390 = vrot.lane.b32.xlu1 %v2389_v23, %s2763_s11 }
 0x3b7   : > { %v1545_v24 = vpop.f32.mrf.mxu1 }
 0x3ec   : > { %v2386_v30 = vpop.permute.xlu2 %2385 }
 0x3ed   : > { %v2388_v33 = vunpack.i.h.bf16 %v2386_v30  ;;  %v2387_v34 = vunpack.i.l.bf16 %v2386_v30 }
 0x3ee   : > { %v2381_v27 = vpop.permute.xlu1 %2380 }
 0x3ef   : > { %v2383_v28 = vunpack.i.h.bf16 %v2381_v27  ;;  %v2382_v29 = vunpack.i.l.bf16 %v2381_v27 }
 0x3f1   : > { %v1593_v31 = vsel %vm1090_vm2, %v1198_v50, %v2383_v28  ;;  %v1592_v32 = vsel %vm1090_vm2, %v1179_v53, %v2382_v29  ;;  %v2401_v29 = vld [vmem:[%s793_s22] ss:$0 sm:$0xff] }
 0x3f2   : > { %v1595_v38 = vsel %vm1594_vm4, %v1592_v32, %v2387_v34  ;;  %v1596_v39 = vsel %vm1594_vm4, %v1593_v31, %v2388_v33 }
 0x424   : > { %v2391_v35 = vpop.permute.xlu1 %2390 }
 0x425   : > { %v2393_v36 = vunpack.i.h.bf16 %v2391_v35  ;;  %v2392_v37 = vunpack.i.l.bf16 %v2391_v35 }
 0x427   : > { %v1598_v40 = vsel %vm1597_vm5, %v1595_v38, %v2392_v37  ;;  %v1599_v41 = vsel %vm1597_vm5, %v1596_v39, %v2393_v36  ;;  %v2261_v36 = vld [vmem:[%s3052_s8 + $0x18] sm:$0xff]  ;;  %v2260_v37 = vld [vmem:[%s3052_s8 + $0x10] sm:$0xff]  ;;  %v2259_v38 = vld [vmem:[%s3052_s8 + $0x8] sm:$0xff] }
 0x428   : > { %v1600_v42 = vpack.c.bf16 %v1599_v41, %v1598_v40  ;;  %1788 = vmatpush.bf16.msrb.mxu1 %v2261_v36  ;;  %v2258_v39 = vld [vmem:[%s3052_s8] sm:$0xff] }
 0x429   : > { %v2402_v41 = vld [vmem:[%s950_s4] ss:$0 sm:$0xff] }
 0x42a   : > { %2211 = vmatmul.msk.bf16.vlgmr.msra.gmra.mxu3 %vm998_vm1, %v1600_v42 }
 0x42c   : > { %1789 = vmatpush.bf16.msrb.mxu1 %v2260_v37 }
 0x430   : > { %1790 = vmatpush.bf16.msrb.mxu1 %v2259_v38 }
 0x434   : > { %1791 = vmatpush.bf16.msrb.mxu1 %v2258_v39 }
 0x4ad   : > { %v1633_v44 = vpop.f32.mrf.mxu3 }
 0x4ae   : > { %v1634_v45 = vadd.f32 %v2399_v43, %v1633_v44 }
 0x4b0   : > { %v1638_v46 = vadd.f32 %v1634_v45, %v3069_v6  ;;  %v3215_v6 = vsel %vm1653_vm6, %v2439_v55, %v1652_v51 }
 0x4b2   : > { %v1642_v47 = vsel %vm998_vm1, %v1638_v46, 0.0 }
 0x4b3   : > { %1643 = vadd.xlane.f32.xlu0 %v1642_v47 }
 0x4b5   : > { %v1635_v49 = vpop.f32.mrf.mxu3 }
 0x4b6   : > { %v1636_v50 = vadd.f32 %v2399_v43, %v1635_v49  ;;  %v2403_v49 = vld [vmem:[%s958_s29] ss:$0 sm:$0xff] }
 0x4b8   : > { %v1639_v52 = vadd.f32 %v1636_v50, %v3071_v7 }
 0x4ba   : > { %v1645_v53 = vsel %vm998_vm1, %v1639_v52, 0.0 }
 0x4bb   : > { %1646 = vadd.xlane.f32.xlu1 %v1645_v53 }
 0x526   : > { %v1644_v58 = vpop.xlane.xlu0 %1643 }
 0x527   : > { %v1655_v59 = vmul.f32 %v3215_v6, %v1644_v58 }
 0x529   : > { %v1657_v60 = vsub.f32 %v1638_v46, %v1655_v59 }
 0x52b   : > { %v1659_v7 = vmul.f32 %v1657_v60, %v1657_v60 }
 0x52d   : > { %v1661_v61 = vsel %vm998_vm1, %v1659_v7, 0.0 }
 0x52e   : > { %v1647_v62 = vpop.xlane.xlu1 %1646  ;;  %1662 = vadd.xlane.f32.xlu0 %v1661_v61 }
 0x52f   : > { %v1656_v63 = vmul.f32 %v3215_v6, %v1647_v62 }
 0x531   : > { %v1658_v0 = vsub.f32 %v1639_v52, %v1656_v63 }
 0x533   : > { %v1660_v1 = vmul.f32 %v1658_v0, %v1658_v0 }
 0x535   : > { %v1664_v2 = vsel %vm998_vm1, %v1660_v1, 0.0 }
 0x536   : > { %1665 = vadd.xlane.f32.xlu0 %v1664_v2 }
 0x5a1   : > { %v1663_v4 = vpop.xlane.xlu0 %1662 }
 0x5a2   : > { %v1667_v5 = vmul.f32 %v1663_v4, %v3215_v6 }
 0x5a4   : > { %v1669_v8 = vadd.f32 1e-05, %v1667_v5 }
 0x5a6   : > { %2440 = vrsqrt.f32 %v1669_v8  ;;  %vm1677_vm8 = vweird.f32 %v1669_v8 }
 0x5a9   : > { %v1666_v10 = vpop.xlane.xlu0 %1665 }
 0x5aa   : > { %v1668_v11 = vmul.f32 %v1666_v10, %v3215_v6 }
 0x5ac   : > { %v2441_v12 = vpop.eup %2440  ;;  %v1670_v13 = vadd.f32 1e-05, %v1668_v11 }
 0x5ad   : > { %v1672_v14 = vmul.f32 %v2441_v12, %v1669_v8  ;;  %vm1678_vm7 = vweird.f32 %v2441_v12 }
 0x5ae   : > { %2442 = vrsqrt.f32 %v1670_v13  ;;  %vm1679_vm9 = vmor %vm1677_vm8, %vm1678_vm7  ;;  %vm1687_vm11 = vweird.f32 %v1670_v13 }
 0x5af   : > { %v1673_v15 = vmul.f32 %v2441_v12, %v1672_v14 }
 0x5b1   : > { %v1674_v16 = vmul.f32 0.5, %v1673_v15 }
 0x5b3   : > { %v1675_v17 = vsub.f32 1.5, %v1674_v16 }
 0x5b4   : > { %v2443_v18 = vpop.eup %2442 }
 0x5b5   : > { %v1676_v19 = vmul.f32 %v2441_v12, %v1675_v17  ;;  %v1682_v20 = vmul.f32 %v2443_v18, %v1670_v13  ;;  %vm1688_vm10 = vweird.f32 %v2443_v18 }
 0x5b6   : > { %vm1689_vm12 = vmor %vm1687_vm11, %vm1688_vm10 }
 0x5b7   : > { %v1683_v21 = vmul.f32 %v2443_v18, %v1682_v20  ;;  %v1680_v22 = vsel %vm1679_vm9, %v2441_v12, %v1676_v19  ;;  %v2405_v20 = vld [vmem:[%s812_s17] ss:$0 sm:$0xff]  ;;  %s1868_s17 = sshll.u32 %s3365_s14, 4  ;;  %s1869_s17 = int_to_ptr.hbm [resolvable:$true] %s1868_s17 }
 0x5b8   : > { %v1691_v26 = vmul.f32 %v1680_v22, %v1657_v60 }
 0x5b9   : > { %v1684_v23 = vmul.f32 0.5, %v1683_v21 }
 0x5ba   : > { %v1696_v30 = vmul.f32 %v2400_v25, %v1691_v26 }
 0x5bb   : > { %v1685_v24 = vsub.f32 1.5, %v1684_v23 }
 0x5bc   : > { %v1701_v33 = vadd.f32 %v2401_v29, %v1696_v30 }
 0x5bd   : > { %v1686_v27 = vmul.f32 %v2443_v18, %v1685_v24 }
 0x5bf   : > { %v1690_v28 = vsel %vm1689_vm12, %v2443_v18, %v1686_v27  ;;  %v2404_v18 = vld [vmem:[%s961_s19] ss:$0 sm:$0xff]  ;;  %s2765_s19 = smov [#allocation12]  }
 0x5c0   : > { %v1692_v31 = vmul.f32 %v1690_v28, %v1658_v0  ;;  %s1866_s27 = sshll.u32 %s2765_s19, 4  ;;  %s1867_s27 = int_to_ptr.vmem [resolvable:$true] %s1866_s27 }
 0x5c2   : > { %v1697_v32 = vmul.f32 %v2400_v25, %v1692_v31 }
 0x5c4   : > { %v1702_v34 = vadd.f32 %v2401_v29, %v1697_v32 }
 0x5c6   : > { %v1703_v35 = vpack.c.bf16 %v1702_v34, %v1701_v33 }
 0x5c8   : > { %2220 = vmatmul.msk.bf16.vlgmr.msrb.gmra.mxu0 %vm998_vm1, %v1703_v35 }
 0x645   : > { %v1736_v40 = vpop.f32.mrf.mxu0 }
 0x646   : > { %v1737_v42 = vadd.f32 %v2402_v41, %v1736_v40 }
 0x648   : > { %v1741_v45 = vmax.f32 %v1737_v42, 0.0 }
 0x64d   : > { %v1738_v43 = vpop.f32.mrf.mxu0 }
 0x64e   : > { %v1739_v44 = vadd.f32 %v2402_v41, %v1738_v43 }
 0x650   : > { %v1742_v46 = vmax.f32 %v1739_v44, 0.0 }
 0x652   : > { %v1743_v47 = vpack.c.bf16 %v1742_v46, %v1741_v45 }
 0x654   : > { %2237 = vmatmul.msk.bf16.vlgmr.msrb.gmra.mxu1 %vm1780_vm13, %v1743_v47 }
 0x6d1   : > { %v1793_v50 = vpop.f32.mrf.mxu1 }
 0x6d2   : > { %v1794_v52 = vadd.f32 %v2403_v49, %v1793_v50 }
 0x6d4   : > { %v1798_v53 = vadd.f32 %v1794_v52, %v1701_v33 }
 0x6d6   : > { %v1802_v54 = vsel %vm998_vm1, %v1798_v53, 0.0 }
 0x6d7   : > { %1803 = vadd.xlane.f32.xlu2 %v1802_v54 }
 0x6d9   : > { %v1795_v55 = vpop.f32.mrf.mxu1 }
 0x6da   : > { %v1796_v56 = vadd.f32 %v2403_v49, %v1795_v55 }
 0x6dc   : > { %v1799_v48 = vadd.f32 %v1796_v56, %v1702_v34 }
 0x6de   : > { %v1805_v57 = vsel %vm998_vm1, %v1799_v48, 0.0 }
 0x6df   : > { %1806 = vadd.xlane.f32.xlu0 %v1805_v57 }
 0x74a   : > { %v1804_v51 = vpop.xlane.xlu2 %1803 }
 0x74b   : > { %v1808_v58 = vmul.f32 %v1804_v51, %v3215_v6 }
 0x74d   : > { %v1810_v59 = vsub.f32 %v1798_v53, %v1808_v58 }
 0x74f   : > { %v1812_v60 = vmul.f32 %v1810_v59, %v1810_v59 }
 0x751   : > { %v1814_v7 = vsel %vm998_vm1, %v1812_v60, 0.0 }
 0x752   : > { %v1807_v61 = vpop.xlane.xlu0 %1806  ;;  %1815 = vadd.xlane.f32.xlu0 %v1814_v7 }
 0x753   : > { %v1809_v62 = vmul.f32 %v1807_v61, %v3215_v6 }
 0x755   : > { %v1811_v63 = vsub.f32 %v1799_v48, %v1809_v62 }
 0x757   : > { %v1813_v0 = vmul.f32 %v1811_v63, %v1811_v63 }
 0x759   : > { %v1817_v1 = vsel %vm998_vm1, %v1813_v0, 0.0 }
 0x75a   : > { %1818 = vadd.xlane.f32.xlu0 %v1817_v1 }
 0x7c5   : > { %v1816_v2 = vpop.xlane.xlu0 %1815 }
 0x7c6   : > { %v1820_v3 = vmul.f32 %v1816_v2, %v3215_v6 }
 0x7c8   : > { %v1822_v4 = vadd.f32 1e-05, %v1820_v3 }
 0x7ca   : > { %2444 = vrsqrt.f32 %v1822_v4  ;;  %vm1830_vm15 = vweird.f32 %v1822_v4 }
 0x7cd   : > { %v1819_v5 = vpop.xlane.xlu0 %1818 }
 0x7ce   : > { %v1821_v8 = vmul.f32 %v1819_v5, %v3215_v6 }
 0x7d0   : > { %v2445_v9 = vpop.eup %2444  ;;  %v1823_v10 = vadd.f32 1e-05, %v1821_v8 }
 0x7d1   : > { %v1825_v11 = vmul.f32 %v2445_v9, %v1822_v4  ;;  %vm1831_vm14 = vweird.f32 %v2445_v9 }
 0x7d2   : > { %2446 = vrsqrt.f32 %v1823_v10  ;;  %vm1832_vm0 = vmor %vm1830_vm15, %vm1831_vm14  ;;  %vm1840_vm3 = vweird.f32 %v1823_v10 }
 0x7d3   : > { %v1826_v12 = vmul.f32 %v2445_v9, %v1825_v11 }
 0x7d5   : > { %v1827_v13 = vmul.f32 0.5, %v1826_v12 }
 0x7d7   : > { %v1828_v14 = vsub.f32 1.5, %v1827_v13 }
 0x7d8   : > { %v2447_v15 = vpop.eup %2446 }
 0x7d9   : > { %v1829_v16 = vmul.f32 %v2445_v9, %v1828_v14  ;;  %v1835_v17 = vmul.f32 %v2447_v15, %v1823_v10  ;;  %vm1841_vm2 = vweird.f32 %v2447_v15 }
 0x7da   : > { %vm1842_vm4 = vmor %vm1840_vm3, %vm1841_vm2 }
 0x7db   : > { %v1833_v6 = vsel %vm1832_vm0, %v2445_v9, %v1829_v16  ;;  %v1836_v19 = vmul.f32 %v2447_v15, %v1835_v17 }
 0x7dc   : > { %v1844_v21 = vmul.f32 %v1833_v6, %v1810_v59 }
 0x7dd   : > { %v1837_v22 = vmul.f32 0.5, %v1836_v19 }
 0x7de   : > { %v1849_v23 = vmul.f32 %v2404_v18, %v1844_v21 }
 0x7df   : > { %v1838_v24 = vsub.f32 1.5, %v1837_v22 }
 0x7e0   : > { %v1854_v25 = vadd.f32 %v2405_v20, %v1849_v23 }
 0x7e1   : > { %v1839_v26 = vmul.f32 %v2447_v15, %v1838_v24 }
 0x7e2   : > { %1856 = vst.msk [vmem:[#allocation12] sm:$0xff] %vm998_vm1, %v1854_v25 }
 0x7e3   : > { %v1843_v27 = vsel %vm1842_vm4, %v2447_v15, %v1839_v26 }
 0x7e4   : > { %v1845_v28 = vmul.f32 %v1843_v27, %v1811_v63 }
 0x7e6   : > { %v1850_v29 = vmul.f32 %v2404_v18, %v1845_v28 }
 0x7e8   : > { %v1855_v30 = vadd.f32 %v2405_v20, %v1850_v29 }
 0x7ea   : > { %1857 = vst.msk [vmem:[#allocation12 + $0x8] sm:$0xff] %vm998_vm1, %v1855_v30 }
 0x7eb   : > { %2281 = dma.vmem_to_hbm [thread:$0]  (%p2312_p3), %s1867_s27, 256, %s1869_s17, [#allocation4], %s2766_s26, %s2766_s26, %s2761_s21  }
 0x7ec   : > { %2723 = dma.done.wait (%p2312_p3), [#allocation4], 256  }
 0x7ed   : > { %2725 = vsyncadd (%p2312_p3), [#allocation4], 4294967040 }
 0x7ee PF: > { %s3366_s2 = sld [smem:[#allocation19_spill]]  ;;  %s3371_s27 = smov %s2732_s28 }
 0x7ef   : > { %s3367_s6 = sld [smem:[#allocation17_spill]] }
 0x7f0   : > { %s3368_s29 = sld [smem:[#allocation21_spill]] }
 0x7f1   : > { %s3369_s30 = sld [smem:[#allocation18_spill]] }
 0x7f2   : > { %s3370_s0 = sld [smem:[#allocation20_spill]] }
 0x7f4   : > { %s31_s19 = sadd.s32 1, %s3366_s2  }
 0x7f5   : > { %p28_p4 = scmp.ge.s32.totalorder %s31_s19, 4   ;;  %s3372_s28 = smov %s3367_s6 }
 0x7f7   :  { %30 = sbr.rel (!%p28_p4) target bundleno = 24 (0x18), region = 220 }
 0x7fc   :  { %1885 = vsyncpa [#allocation3], 1 }
 0x7fd   :  { %1887 = vsyncpa [#allocation3 + $0x1], 1 }
 0x7fe   :  { %1888 = vsyncpa [#allocation6], 1 }
 0x7ff   :  { %1889 = vsyncpa [#allocation4], 1 }
 0x800   :  { %1891 = vsyncpa [#allocation4 + $0x1], 1 }

</bundles_post_ra>
